<compile_context>
chip_gen: v7x
topology: tpu7x:2x2x1
jax: 0.10.0
libtpu: 0.0.40
codegen_flags: <defaults>
</compile_context>

<pallas_src>
import math

import jax
import jax.numpy as jnp
import numpy as np
from jax.experimental import pallas as pl
from jax.experimental.pallas import tpu as pltpu

# ----------------------------- configuration --------------------------------
B = 2            # batch
S = 8            # sequence length (number of boxes)
BS = B * S       # flattened batch*seq
H = 32           # hidden_size
NH = 4           # num_heads
HD = H // NH     # per-head dim
BOX_DIM = 4      # box_dim
AUG = 64         # aug_size (box embedding width)
FF = 4 * H       # ff_size
EPS = 1e-6
BLANK = 2.0      # blank_box value
NEG = -1e9       # additive mask bias
LANES = 128      # lane width of the packed slabs

# data slab lane offsets (single (BS, 320) f32 slab; 64-wide regions start on
# 128-lane tile boundaries so in-kernel slices stay tile-aligned)
D_CTX = 0                  # (BS, H)        context
D_BOX = 32                 # (BS, BOX_DIM)  raw boxes
D_MASK = 40                # (BS, 1)        per-box validity (blank fill)
D_KBIAS = 128              # (BS, NH*BS)    head-tiled additive key bias
D_PDF = 256                # (BS, NH*BS)    head-tiled block-diag xy_pdf_score
D_W = 320

# weight slab row offsets (single (408, 128) f32 slab; every block 8-aligned)
R_WBE = 0                  # (BOX_DIM, AUG)  box embedding
R_WCOMB = 8                # (H+AUG, H)      [wcc ; wcb] combine
R_WQKV = 104               # (H, 3H)         [wq | wk | wv]
R_WO = 136                 # (H, H)          attention output proj
R_WF1 = 168                # (H, FF)
R_WF2 = 200                # (FF, H)
R_VEC = 328                # (12, 128)       biases / LN gamma,beta
R_SEG = 344                # (NH*BS, NH*BS)  head-block-diagonal ones
R_ROWS = 408


# ------------------------------- kernel --------------------------------------
def refine_encoder_kernel(data_ref, w_ref, out_ref):
    f32 = jnp.float32

    # ---- unpack activations (static lane slices of the data slab) ----
    ctx = data_ref[:, D_CTX:D_CTX + H]                    # (16, 32)
    box = data_ref[:, D_BOX:D_BOX + BOX_DIM]              # (16, 4)
    mcol = data_ref[:, D_MASK:D_MASK + 1]                 # (16, 1)
    kbias = data_ref[:, D_KBIAS:D_KBIAS + NH * BS]        # (16, 64)
    pdf = data_ref[:, D_PDF:D_PDF + NH * BS]              # (16, 64)

    # ---- unpack weights (static row/lane slices of the weight slab) ----
    wbe = w_ref[R_WBE:R_WBE + BOX_DIM, :AUG]              # (4, 64)
    wcomb = w_ref[R_WCOMB:R_WCOMB + H + AUG, :H]          # (96, 32)
    wqkv = w_ref[R_WQKV:R_WQKV + H, :3 * H]               # (32, 96)
    wo = w_ref[R_WO:R_WO + H, :H]                         # (32, 32)
    wf1 = w_ref[R_WF1:R_WF1 + H, :FF]                     # (32, 128)
    wf2 = w_ref[R_WF2:R_WF2 + FF, :H]                     # (128, 32)
    segs = w_ref[R_SEG:R_SEG + NH * BS, :NH * BS]         # (64, 64) constant
    vp = w_ref[R_VEC:R_VEC + 12, :]                       # (12, 128)

    b_be = vp[0:1, :AUG]
    b_c = vp[1:2, :H]
    g1, b1 = vp[2:3, :H], vp[3:4, :H]
    b_qkv = vp[4:5, :3 * H]
    b_o = vp[5:6, :H]
    g2, b2 = vp[6:7, :H], vp[7:8, :H]
    b_f1 = vp[8:9, :FF]
    b_f2 = vp[9:10, :H]
    g3, b3 = vp[10:11, :H], vp[11:12, :H]

    def ln(t, g, b):
        # E[x^2] - mean^2: the two cross-lane reductions are independent
        mu = jnp.mean(t, axis=-1, keepdims=True)
        ms = jnp.mean(t * t, axis=-1, keepdims=True)
        var = ms - mu * mu
        return (t - mu) * jax.lax.rsqrt(var + EPS) * g + b

    # ---- blank-box fill + box embedding + combine(context, box_embed) ----
    boxb = jnp.where(mcol > 0.5, box, f32(BLANK))
    be = jnp.dot(boxb, wbe, preferred_element_type=f32) + b_be        # (16, 64)
    xin = jnp.concatenate([ctx, be], axis=1)                          # (16, 96)
    x = jnp.dot(xin, wcomb, preferred_element_type=f32) + b_c         # (16, 32)

    # ---- pre-LN + fused QKV projection ----
    xn = ln(x, g1, b1)
    qkv = jnp.dot(xn, wqkv, preferred_element_type=f32) + b_qkv       # (16, 96)
    q, k, v = qkv[:, :H], qkv[:, H:2 * H], qkv[:, 2 * H:]

    # ---- attention: batches AND heads batched along lanes ----
    # 4 score dots + 4 p@v dots + 1 segment-sum matmul; cross-batch blocks are
    # killed by the precomputed -1e9 bias, so one max/exp/normalize pass covers
    # every (batch, head) softmax at once.
    scale = f32(1.0 / math.sqrt(HD))
    dn = (((1,), (1,)), ((), ()))   # contract last dims: q @ k^T, no transpose
    sc = jnp.concatenate(
        [jax.lax.dot_general(q[:, h * HD:(h + 1) * HD],
                             k[:, h * HD:(h + 1) * HD], dn,
                             preferred_element_type=f32)
         for h in range(NH)], axis=1)                                 # (16, 64)
    sc = sc * scale + kbias
    # common per-row shift (constant within each (batch,head) segment ->
    # softmax unchanged; masked/cross-batch lanes underflow to exactly 0)
    sc = sc - jnp.max(sc, axis=-1, keepdims=True)
    e = jnp.exp(sc)                                                   # one EUP pass
    denom = jnp.dot(e, segs, preferred_element_type=f32)              # segment sums
    r = pl.reciprocal(denom, approx=True)
    r = r * (2.0 - denom * r)            # one Newton step -> f32-accurate 1/denom
    p = e * r * pdf                                                   # pdf modulation
    ctx_att = jnp.concatenate(
        [jnp.dot(p[:, h * BS:(h + 1) * BS], v[:, h * HD:(h + 1) * HD],
                 preferred_element_type=f32)
         for h in range(NH)], axis=1)                                 # (16, 32)

    # ---- single output projection + residual ----
    attn = jnp.dot(ctx_att, wo, preferred_element_type=f32) + b_o     # (16, 32)
    h1 = attn + x

    # ---- position-wise feed forward (pre-LN) + residual ----
    hn = ln(h1, g2, b2)
    ff = jnp.maximum(jnp.dot(hn, wf1, preferred_element_type=f32) + b_f1, 0.0)
    ff = jnp.dot(ff, wf2, preferred_element_type=f32) + b_f2
    o = h1 + ff

    # ---- Refine_Encoder final LayerNorm (single contiguous (16,32) store) ----
    out_ref[...] = ln(o, g3, b3).astype(out_ref.dtype)


# ------------------------------- packing -------------------------------------
def pack_weights(p):
    """Pack all parameters + the seg-sum constant into one (408,128) f32 slab."""
    def row128(v):
        v = jnp.reshape(jnp.asarray(v, jnp.float32), (-1,))
        return jnp.pad(v, (0, LANES - v.shape[0]))

    def blk(m, rows):
        m = jnp.asarray(m, jnp.float32)
        return jnp.pad(m, ((0, rows - m.shape[0]), (0, LANES - m.shape[1])))

    vec = jnp.stack([
        row128(p["bbe"]),                                              # 0
        row128(p["bc"]),                                               # 1
        row128(p["g1"]), row128(p["b1"]),                              # 2, 3
        row128(jnp.concatenate([p["bq"], p["bk"], p["bv"]], axis=1)),  # 4
        row128(p["bo"]),                                               # 5
        row128(p["g2"]), row128(p["b2"]),                              # 6, 7
        row128(p["bf1"]),                                              # 8
        row128(p["bf2"]),                                              # 9
        row128(p["g3"]), row128(p["b3"]),                              # 10, 11
    ])                                                                 # (12, 128)
    w_comb = jnp.concatenate([p["wcc"], p["wcb"]], axis=0)             # (96, 32)
    w_qkv = jnp.concatenate([p["wq"], p["wk"], p["wv"]], axis=1)       # (32, 96)
    # head-block-diagonal ones: matmul with it = per-(head) segment sums,
    # broadcast back to every lane of the segment
    seg = jnp.asarray(np.kron(np.eye(NH), np.ones((BS, BS))), jnp.float32)

    slab = jnp.concatenate([
        blk(p["wbe"], 8),        # R_WBE
        blk(w_comb, 96),         # R_WCOMB
        blk(w_qkv, 32),          # R_WQKV
        blk(p["wo"], 32),        # R_WO
        blk(p["w1"], 32),        # R_WF1
        blk(p["w2"], FF),        # R_WF2
        blk(vec, 16),            # R_VEC
        blk(seg, NH * BS),       # R_SEG
    ], axis=0)
    assert slab.shape == (R_ROWS, LANES)
    return slab


def pack_data(context, input_box, mask_f, xy_pdf_score):
    """Pack the 5 data inputs into one (16, 320) f32 slab (layout plumbing)."""
    f32 = jnp.float32
    ctx_f = context.reshape(BS, H).astype(f32)
    box_f = input_box[..., :BOX_DIM].reshape(BS, BOX_DIM).astype(f32)
    mcol_f = jnp.transpose(mask_f, (0, 2, 1)).reshape(BS, 1).astype(f32)

    key_valid = mask_f[:, 0, :].astype(f32)                           # (B, S)
    eye_b = jnp.eye(B, dtype=f32)
    # valid[b, c*S+j] = 1 iff key (c,j) is a valid key for queries of batch b
    valid = jnp.einsum("bc,cj->bcj", eye_b, key_valid).reshape(B, BS)
    kbias = jnp.where(valid > 0.5, f32(0.0), f32(NEG))                # (B, 16)
    kbias = jnp.tile(jnp.repeat(kbias, S, axis=0), (1, NH))           # (16, 64)

    # block-diagonal pdf over batches, tiled per head along lanes
    pdf_bd = jnp.einsum("bij,bc->bicj", xy_pdf_score.astype(f32),
                        eye_b).reshape(BS, BS)
    pdf_t = jnp.tile(pdf_bd, (1, NH))                                 # (16, 64)

    z = lambda w: jnp.zeros((BS, w), f32)
    data = jnp.concatenate([
        ctx_f,                              # lanes   0: 32
        box_f,                              # lanes  32: 36
        z(D_MASK - (D_BOX + BOX_DIM)),      # lanes  36: 40
        mcol_f,                             # lanes  40: 41
        z(D_KBIAS - (D_MASK + 1)),          # lanes  41:128
        kbias,                              # lanes 128:192
        z(D_PDF - (D_KBIAS + NH * BS)),     # lanes 192:256
        pdf_t,                              # lanes 256:320
    ], axis=1)
    return data


# ------------------------------- wrapper --------------------------------------
@jax.jit
def refine_encoder_pallas(context, input_box, mask_f, xy_pdf_score, w_slab):
    data = pack_data(context, input_box, mask_f, xy_pdf_score)
    vmem = pl.BlockSpec(memory_space=pltpu.MemorySpace.VMEM)
    # TODO(synk): for large batches / stacked layers, add a grid over batch with
    # compiler_params=pltpu.CompilerParams(dimension_semantics=("parallel",)) so
    # v7x's second TensorCore gets work; at B=2, S=8 a gridless call is cheapest.
    out = pl.pallas_call(
        refine_encoder_kernel,
        out_shape=jax.ShapeDtypeStruct((BS, H), jnp.float32),
        in_specs=[vmem, vmem],
        out_specs=vmem,
    )(data, w_slab)
    return out.reshape(B, S, H)


# --------------------------- pure-JAX reference -------------------------------
def refine_encoder_ref(context, input_box, mask_f, pdf, p):
    def ln(t, g, b):
        mu = jnp.mean(t, axis=-1, keepdims=True)
        var = jnp.mean(jnp.square(t - mu), axis=-1, keepdims=True)
        return (t - mu) * jax.lax.rsqrt(var + EPS) * g + b

    box = input_box[..., :BOX_DIM]
    mcol = jnp.transpose(mask_f, (0, 2, 1))            # (B, S, 1)
    box = jnp.where(mcol > 0.5, box, BLANK)
    be = box @ p["wbe"] + p["bbe"]
    x = context @ p["wcc"] + be @ p["wcb"] + p["bc"]
    xn = ln(x, p["g1"], p["b1"])
    q = xn @ p["wq"] + p["bq"]
    k = xn @ p["wk"] + p["bk"]
    v = xn @ p["wv"] + p["bv"]
    scale = 1.0 / math.sqrt(HD)
    outs = jnp.zeros_like(x)
    for h in range(NH):
        sl = slice(h * HD, (h + 1) * HD)
        sc = jnp.einsum("bqd,bkd->bqk", q[..., sl], k[..., sl]) * scale
        sc = jnp.where(mask_f > 0.5, sc, NEG)
        sc = sc - jnp.max(sc, axis=-1, keepdims=True)
        e = jnp.exp(sc)
        pr = e / jnp.sum(e, axis=-1, keepdims=True)
        pr = pr * pdf
        oh = jnp.einsum("bqk,bkd->bqd", pr, v[..., sl])
        outs = outs + oh @ p["wo"][sl, :]
    attn_out = outs + p["bo"]
    h1 = attn_out + x
    hn = ln(h1, p["g2"], p["b2"])
    ff = jnp.maximum(hn @ p["w1"] + p["bf1"], 0.0) @ p["w2"] + p["bf2"]
    o = h1 + ff
    return ln(o, p["g3"], p["b3"])


# ----------------------------------- main -------------------------------------
if __name__ == "__main__":
    key = jax.random.PRNGKey(0)
    keys = jax.random.split(key, 32)
    ki = iter(keys)

    def nrm(shape, scale=0.1):
        return jax.random.normal(next(ki), shape, jnp.float32) * scale

    params = {
        "wbe": nrm((BOX_DIM, AUG)), "bbe": nrm((1, AUG), 0.02),
        "wcc": nrm((H, H)), "wcb": nrm((AUG, H)), "bc": nrm((1, H), 0.02),
        "g1": jnp.ones((1, H), jnp.float32) + nrm((1, H), 0.01),
        "b1": nrm((1, H), 0.01),
        "wq": nrm((H, H)), "bq": nrm((1, H), 0.02),
        "wk": nrm((H, H)), "bk": nrm((1, H), 0.02),
        "wv": nrm((H, H)), "bv": nrm((1, H), 0.02),
        "wo": nrm((H, H)), "bo": nrm((1, H), 0.02),
        "g2": jnp.ones((1, H), jnp.float32) + nrm((1, H), 0.01),
        "b2": nrm((1, H), 0.01),
        "w1": nrm((H, FF)), "bf1": nrm((1, FF), 0.02),
        "w2": nrm((FF, H)), "bf2": nrm((1, H), 0.02),
        "g3": jnp.ones((1, H), jnp.float32) + nrm((1, H), 0.01),
        "b3": nrm((1, H), 0.01),
    }

    # example inputs (forward signature: context, input_box, mask, xy_pdf_score)
    context = jax.random.normal(next(ki), (B, S, H), jnp.float32)
    input_box = jax.random.uniform(next(ki), (B, S, BOX_DIM + 4), jnp.float32)
    lengths = [6, 5]
    mask_np = np.zeros((B, 1, S), np.float32)
    for b in range(B):
        mask_np[b, 0, :lengths[b]] = 1.0
    mask_f = jnp.asarray(mask_np)                     # bool mask carried as f32
    xy_pdf_score = jax.random.uniform(
        next(ki), (B, S, S), jnp.float32, minval=0.1, maxval=1.0)

    w_slab = pack_weights(params)                     # packed once, reused per call
    out = refine_encoder_pallas(context, input_box, mask_f, xy_pdf_score, w_slab)
    out = jax.block_until_ready(out)

    ref = refine_encoder_ref(context, input_box, mask_f, xy_pdf_score, params)
    np.testing.assert_allclose(np.asarray(out), np.asarray(ref),
                               rtol=2e-4, atol=2e-4)
    print("KERNEL_OK")
</pallas_src>

<mosaic_0001>
module attributes {stable_mosaic.version = 11 : i64} {
  func.func @refine_encoder_kernel(%arg0: memref<16x320xf32, #tpu.memory_space<vmem>>, %arg1: memref<408x128xf32, #tpu.memory_space<vmem>>, %arg2: memref<16x32xf32, #tpu.memory_space<vmem>>) attributes {dimension_semantics = [], scalar_prefetch = 0 : i64, scratch_operands = 0 : i64, tpu.core_type = #tpu.core_type<tc>} {
    %c0 = arith.constant 0 : index
    %c0_0 = arith.constant 0 : index
    %0 = vector.load %arg0[%c0, %c0_0] : memref<16x320xf32, #tpu.memory_space<vmem>>, vector<16x32xf32>
    %c0_1 = arith.constant 0 : index
    %c32 = arith.constant 32 : index
    %1 = vector.load %arg0[%c0_1, %c32] : memref<16x320xf32, #tpu.memory_space<vmem>>, vector<16x4xf32>
    %c0_2 = arith.constant 0 : index
    %c40 = arith.constant 40 : index
    %2 = vector.load %arg0[%c0_2, %c40] : memref<16x320xf32, #tpu.memory_space<vmem>>, vector<16x1xf32>
    %c0_3 = arith.constant 0 : index
    %c128 = arith.constant 128 : index
    %3 = vector.load %arg0[%c0_3, %c128] : memref<16x320xf32, #tpu.memory_space<vmem>>, vector<16x64xf32>
    %c0_4 = arith.constant 0 : index
    %c256 = arith.constant 256 : index
    %4 = vector.load %arg0[%c0_4, %c256] : memref<16x320xf32, #tpu.memory_space<vmem>>, vector<16x64xf32>
    %c0_5 = arith.constant 0 : index
    %c0_6 = arith.constant 0 : index
    %5 = vector.load %arg1[%c0_5, %c0_6] : memref<408x128xf32, #tpu.memory_space<vmem>>, vector<4x64xf32>
    %c8 = arith.constant 8 : index
    %c0_7 = arith.constant 0 : index
    %6 = vector.load %arg1[%c8, %c0_7] : memref<408x128xf32, #tpu.memory_space<vmem>>, vector<96x32xf32>
    %c104 = arith.constant 104 : index
    %c0_8 = arith.constant 0 : index
    %7 = vector.load %arg1[%c104, %c0_8] : memref<408x128xf32, #tpu.memory_space<vmem>>, vector<32x96xf32>
    %c136 = arith.constant 136 : index
    %c0_9 = arith.constant 0 : index
    %8 = vector.load %arg1[%c136, %c0_9] : memref<408x128xf32, #tpu.memory_space<vmem>>, vector<32x32xf32>
    %c168 = arith.constant 168 : index
    %c0_10 = arith.constant 0 : index
    %9 = vector.load %arg1[%c168, %c0_10] : memref<408x128xf32, #tpu.memory_space<vmem>>, vector<32x128xf32>
    %c200 = arith.constant 200 : index
    %c0_11 = arith.constant 0 : index
    %10 = vector.load %arg1[%c200, %c0_11] : memref<408x128xf32, #tpu.memory_space<vmem>>, vector<128x32xf32>
    %c344 = arith.constant 344 : index
    %c0_12 = arith.constant 0 : index
    %11 = vector.load %arg1[%c344, %c0_12] : memref<408x128xf32, #tpu.memory_space<vmem>>, vector<64x64xf32>
    %c328 = arith.constant 328 : index
    %c0_13 = arith.constant 0 : index
    %12 = vector.load %arg1[%c328, %c0_13] : memref<408x128xf32, #tpu.memory_space<vmem>>, vector<12x128xf32>
    %13 = vector.extract_strided_slice %12 {offsets = [0, 0], sizes = [1, 64], strides = [1, 1]} : vector<12x128xf32> to vector<1x64xf32>
    %14 = vector.extract_strided_slice %12 {offsets = [1, 0], sizes = [1, 32], strides = [1, 1]} : vector<12x128xf32> to vector<1x32xf32>
    %15 = vector.extract_strided_slice %12 {offsets = [2, 0], sizes = [1, 32], strides = [1, 1]} : vector<12x128xf32> to vector<1x32xf32>
    %16 = vector.extract_strided_slice %12 {offsets = [3, 0], sizes = [1, 32], strides = [1, 1]} : vector<12x128xf32> to vector<1x32xf32>
    %17 = vector.extract_strided_slice %12 {offsets = [4, 0], sizes = [1, 96], strides = [1, 1]} : vector<12x128xf32> to vector<1x96xf32>
    %18 = vector.extract_strided_slice %12 {offsets = [5, 0], sizes = [1, 32], strides = [1, 1]} : vector<12x128xf32> to vector<1x32xf32>
    %19 = vector.extract_strided_slice %12 {offsets = [6, 0], sizes = [1, 32], strides = [1, 1]} : vector<12x128xf32> to vector<1x32xf32>
    %20 = vector.extract_strided_slice %12 {offsets = [7, 0], sizes = [1, 32], strides = [1, 1]} : vector<12x128xf32> to vector<1x32xf32>
    %21 = vector.extract_strided_slice %12 {offsets = [8, 0], sizes = [1, 128], strides = [1, 1]} : vector<12x128xf32> to vector<1x128xf32>
    %22 = vector.extract_strided_slice %12 {offsets = [9, 0], sizes = [1, 32], strides = [1, 1]} : vector<12x128xf32> to vector<1x32xf32>
    %23 = vector.extract_strided_slice %12 {offsets = [10, 0], sizes = [1, 32], strides = [1, 1]} : vector<12x128xf32> to vector<1x32xf32>
    %24 = vector.extract_strided_slice %12 {offsets = [11, 0], sizes = [1, 32], strides = [1, 1]} : vector<12x128xf32> to vector<1x32xf32>
    %cst = arith.constant 5.000000e-01 : f32
    %25 = vector.broadcast %cst : f32 to vector<16x1xf32>
    %26 = arith.cmpf ogt, %2, %25 : vector<16x1xf32>
    %cst_14 = arith.constant 2.000000e+00 : f32
    %27 = vector.shape_cast %26 : vector<16x1xi1> to vector<16x1xi1>
    %28 = vector.broadcast %27 : vector<16x1xi1> to vector<16x4xi1>
    %29 = vector.broadcast %cst_14 : f32 to vector<16x4xf32>
    %30 = arith.select %28, %1, %29 : vector<16x4xi1>, vector<16x4xf32>
    %cst_15 = arith.constant dense<0.000000e+00> : vector<16x64xf32>
    %31 = tpu.matmul %30, %5, %cst_15 {dimension_numbers = #tpu.dot_dimension_numbers<[1], [0], [0], [1], [0, 0, 1, 1], [], []>} : vector<16x4xf32>, vector<4x64xf32>, vector<16x64xf32> -> vector<16x64xf32>
    %32 = vector.broadcast %13 : vector<1x64xf32> to vector<16x64xf32>
    %33 = arith.addf %31, %32 : vector<16x64xf32>
    %34 = tpu.concatenate %0, %33 in 1 : vector<16x32xf32>, vector<16x64xf32> -> vector<16x96xf32>
    %cst_16 = arith.constant dense<0.000000e+00> : vector<16x32xf32>
    %35 = tpu.matmul %34, %6, %cst_16 {dimension_numbers = #tpu.dot_dimension_numbers<[1], [0], [0], [1], [0, 0, 1, 1], [], []>} : vector<16x96xf32>, vector<96x32xf32>, vector<16x32xf32> -> vector<16x32xf32>
    %36 = vector.broadcast %14 : vector<1x32xf32> to vector<16x32xf32>
    %37 = arith.addf %35, %36 : vector<16x32xf32>
    %cst_17 = arith.constant dense<0.000000e+00> : vector<16xf32>
    %38 = vector.multi_reduction <add>, %37, %cst_17 [1] : vector<16x32xf32> to vector<16xf32>
    %39 = vector.shape_cast %38 : vector<16xf32> to vector<16x1xf32>
    %cst_18 = arith.constant 3.200000e+01 : f32
    %40 = vector.broadcast %cst_18 : f32 to vector<16x1xf32>
    %41 = arith.divf %39, %40 : vector<16x1xf32>
    %42 = arith.mulf %37, %37 : vector<16x32xf32>
    %cst_19 = arith.constant dense<0.000000e+00> : vector<16xf32>
    %43 = vector.multi_reduction <add>, %42, %cst_19 [1] : vector<16x32xf32> to vector<16xf32>
    %44 = vector.shape_cast %43 : vector<16xf32> to vector<16x1xf32>
    %cst_20 = arith.constant 3.200000e+01 : f32
    %45 = vector.broadcast %cst_20 : f32 to vector<16x1xf32>
    %46 = arith.divf %44, %45 : vector<16x1xf32>
    %47 = arith.mulf %41, %41 : vector<16x1xf32>
    %48 = arith.subf %46, %47 : vector<16x1xf32>
    %49 = vector.broadcast %41 : vector<16x1xf32> to vector<16x32xf32>
    %50 = arith.subf %37, %49 : vector<16x32xf32>
    %cst_21 = arith.constant 9.99999997E-7 : f32
    %51 = vector.broadcast %cst_21 : f32 to vector<16x1xf32>
    %52 = arith.addf %48, %51 : vector<16x1xf32>
    %53 = math.rsqrt %52 : vector<16x1xf32>
    %54 = vector.broadcast %53 : vector<16x1xf32> to vector<16x32xf32>
    %55 = arith.mulf %50, %54 : vector<16x32xf32>
    %56 = vector.broadcast %15 : vector<1x32xf32> to vector<16x32xf32>
    %57 = arith.mulf %55, %56 : vector<16x32xf32>
    %58 = vector.broadcast %16 : vector<1x32xf32> to vector<16x32xf32>
    %59 = arith.addf %57, %58 : vector<16x32xf32>
    %cst_22 = arith.constant dense<0.000000e+00> : vector<16x96xf32>
    %60 = tpu.matmul %59, %7, %cst_22 {dimension_numbers = #tpu.dot_dimension_numbers<[1], [0], [0], [1], [0, 0, 1, 1], [], []>} : vector<16x32xf32>, vector<32x96xf32>, vector<16x96xf32> -> vector<16x96xf32>
    %61 = vector.broadcast %17 : vector<1x96xf32> to vector<16x96xf32>
    %62 = arith.addf %60, %61 : vector<16x96xf32>
    %63 = vector.extract_strided_slice %62 {offsets = [0, 0], sizes = [16, 32], strides = [1, 1]} : vector<16x96xf32> to vector<16x32xf32>
    %64 = vector.extract_strided_slice %62 {offsets = [0, 32], sizes = [16, 32], strides = [1, 1]} : vector<16x96xf32> to vector<16x32xf32>
    %65 = vector.extract_strided_slice %62 {offsets = [0, 64], sizes = [16, 32], strides = [1, 1]} : vector<16x96xf32> to vector<16x32xf32>
    %66 = vector.extract_strided_slice %63 {offsets = [0, 0], sizes = [16, 8], strides = [1, 1]} : vector<16x32xf32> to vector<16x8xf32>
    %67 = vector.extract_strided_slice %64 {offsets = [0, 0], sizes = [16, 8], strides = [1, 1]} : vector<16x32xf32> to vector<16x8xf32>
    %cst_23 = arith.constant dense<0.000000e+00> : vector<16x16xf32>
    %68 = tpu.matmul %66, %67, %cst_23 {dimension_numbers = #tpu.dot_dimension_numbers<[1], [1], [0], [0], [0, 0, 1, 0], [], []>} : vector<16x8xf32>, vector<16x8xf32>, vector<16x16xf32> -> vector<16x16xf32>
    %69 = vector.extract_strided_slice %63 {offsets = [0, 8], sizes = [16, 8], strides = [1, 1]} : vector<16x32xf32> to vector<16x8xf32>
    %70 = vector.extract_strided_slice %64 {offsets = [0, 8], sizes = [16, 8], strides = [1, 1]} : vector<16x32xf32> to vector<16x8xf32>
    %cst_24 = arith.constant dense<0.000000e+00> : vector<16x16xf32>
    %71 = tpu.matmul %69, %70, %cst_24 {dimension_numbers = #tpu.dot_dimension_numbers<[1], [1], [0], [0], [0, 0, 1, 0], [], []>} : vector<16x8xf32>, vector<16x8xf32>, vector<16x16xf32> -> vector<16x16xf32>
    %72 = vector.extract_strided_slice %63 {offsets = [0, 16], sizes = [16, 8], strides = [1, 1]} : vector<16x32xf32> to vector<16x8xf32>
    %73 = vector.extract_strided_slice %64 {offsets = [0, 16], sizes = [16, 8], strides = [1, 1]} : vector<16x32xf32> to vector<16x8xf32>
    %cst_25 = arith.constant dense<0.000000e+00> : vector<16x16xf32>
    %74 = tpu.matmul %72, %73, %cst_25 {dimension_numbers = #tpu.dot_dimension_numbers<[1], [1], [0], [0], [0, 0, 1, 0], [], []>} : vector<16x8xf32>, vector<16x8xf32>, vector<16x16xf32> -> vector<16x16xf32>
    %75 = vector.extract_strided_slice %63 {offsets = [0, 24], sizes = [16, 8], strides = [1, 1]} : vector<16x32xf32> to vector<16x8xf32>
    %76 = vector.extract_strided_slice %64 {offsets = [0, 24], sizes = [16, 8], strides = [1, 1]} : vector<16x32xf32> to vector<16x8xf32>
    %cst_26 = arith.constant dense<0.000000e+00> : vector<16x16xf32>
    %77 = tpu.matmul %75, %76, %cst_26 {dimension_numbers = #tpu.dot_dimension_numbers<[1], [1], [0], [0], [0, 0, 1, 0], [], []>} : vector<16x8xf32>, vector<16x8xf32>, vector<16x16xf32> -> vector<16x16xf32>
    %78 = tpu.concatenate %68, %71, %74, %77 in 1 : vector<16x16xf32>, vector<16x16xf32>, vector<16x16xf32>, vector<16x16xf32> -> vector<16x64xf32>
    %cst_27 = arith.constant 0.353553385 : f32
    %79 = vector.broadcast %cst_27 : f32 to vector<16x64xf32>
    %80 = arith.mulf %78, %79 : vector<16x64xf32>
    %81 = arith.addf %80, %3 : vector<16x64xf32>
    %cst_28 = arith.constant dense<0xFF800000> : vector<16xf32>
    %82 = vector.multi_reduction <maximumf>, %81, %cst_28 [1] : vector<16x64xf32> to vector<16xf32>
    %83 = vector.shape_cast %82 : vector<16xf32> to vector<16x1xf32>
    %84 = vector.broadcast %83 : vector<16x1xf32> to vector<16x64xf32>
    %85 = arith.subf %81, %84 : vector<16x64xf32>
    %86 = math.exp %85 : vector<16x64xf32>
    %cst_29 = arith.constant dense<0.000000e+00> : vector<16x64xf32>
    %87 = tpu.matmul %86, %11, %cst_29 {dimension_numbers = #tpu.dot_dimension_numbers<[1], [0], [0], [1], [0, 0, 1, 1], [], []>} : vector<16x64xf32>, vector<64x64xf32>, vector<16x64xf32> -> vector<16x64xf32>
    %88 = tpu.reciprocal %87 {approx = true} : vector<16x64xf32> -> vector<16x64xf32>
    %89 = arith.mulf %87, %88 : vector<16x64xf32>
    %cst_30 = arith.constant 2.000000e+00 : f32
    %90 = vector.broadcast %cst_30 : f32 to vector<16x64xf32>
    %91 = arith.subf %90, %89 : vector<16x64xf32>
    %92 = arith.mulf %88, %91 : vector<16x64xf32>
    %93 = arith.mulf %86, %92 : vector<16x64xf32>
    %94 = arith.mulf %93, %4 : vector<16x64xf32>
    %95 = vector.extract_strided_slice %94 {offsets = [0, 0], sizes = [16, 16], strides = [1, 1]} : vector<16x64xf32> to vector<16x16xf32>
    %96 = vector.extract_strided_slice %65 {offsets = [0, 0], sizes = [16, 8], strides = [1, 1]} : vector<16x32xf32> to vector<16x8xf32>
    %cst_31 = arith.constant dense<0.000000e+00> : vector<16x8xf32>
    %97 = tpu.matmul %95, %96, %cst_31 {dimension_numbers = #tpu.dot_dimension_numbers<[1], [0], [0], [1], [0, 0, 1, 1], [], []>} : vector<16x16xf32>, vector<16x8xf32>, vector<16x8xf32> -> vector<16x8xf32>
    %98 = vector.extract_strided_slice %94 {offsets = [0, 16], sizes = [16, 16], strides = [1, 1]} : vector<16x64xf32> to vector<16x16xf32>
    %99 = vector.extract_strided_slice %65 {offsets = [0, 8], sizes = [16, 8], strides = [1, 1]} : vector<16x32xf32> to vector<16x8xf32>
    %cst_32 = arith.constant dense<0.000000e+00> : vector<16x8xf32>
    %100 = tpu.matmul %98, %99, %cst_32 {dimension_numbers = #tpu.dot_dimension_numbers<[1], [0], [0], [1], [0, 0, 1, 1], [], []>} : vector<16x16xf32>, vector<16x8xf32>, vector<16x8xf32> -> vector<16x8xf32>
    %101 = vector.extract_strided_slice %94 {offsets = [0, 32], sizes = [16, 16], strides = [1, 1]} : vector<16x64xf32> to vector<16x16xf32>
    %102 = vector.extract_strided_slice %65 {offsets = [0, 16], sizes = [16, 8], strides = [1, 1]} : vector<16x32xf32> to vector<16x8xf32>
    %cst_33 = arith.constant dense<0.000000e+00> : vector<16x8xf32>
    %103 = tpu.matmul %101, %102, %cst_33 {dimension_numbers = #tpu.dot_dimension_numbers<[1], [0], [0], [1], [0, 0, 1, 1], [], []>} : vector<16x16xf32>, vector<16x8xf32>, vector<16x8xf32> -> vector<16x8xf32>
    %104 = vector.extract_strided_slice %94 {offsets = [0, 48], sizes = [16, 16], strides = [1, 1]} : vector<16x64xf32> to vector<16x16xf32>
    %105 = vector.extract_strided_slice %65 {offsets = [0, 24], sizes = [16, 8], strides = [1, 1]} : vector<16x32xf32> to vector<16x8xf32>
    %cst_34 = arith.constant dense<0.000000e+00> : vector<16x8xf32>
    %106 = tpu.matmul %104, %105, %cst_34 {dimension_numbers = #tpu.dot_dimension_numbers<[1], [0], [0], [1], [0, 0, 1, 1], [], []>} : vector<16x16xf32>, vector<16x8xf32>, vector<16x8xf32> -> vector<16x8xf32>
    %107 = tpu.concatenate %97, %100, %103, %106 in 1 : vector<16x8xf32>, vector<16x8xf32>, vector<16x8xf32>, vector<16x8xf32> -> vector<16x32xf32>
    %cst_35 = arith.constant dense<0.000000e+00> : vector<16x32xf32>
    %108 = tpu.matmul %107, %8, %cst_35 {dimension_numbers = #tpu.dot_dimension_numbers<[1], [0], [0], [1], [0, 0, 1, 1], [], []>} : vector<16x32xf32>, vector<32x32xf32>, vector<16x32xf32> -> vector<16x32xf32>
    %109 = vector.broadcast %18 : vector<1x32xf32> to vector<16x32xf32>
    %110 = arith.addf %108, %109 : vector<16x32xf32>
    %111 = arith.addf %110, %37 : vector<16x32xf32>
    %cst_36 = arith.constant dense<0.000000e+00> : vector<16xf32>
    %112 = vector.multi_reduction <add>, %111, %cst_36 [1] : vector<16x32xf32> to vector<16xf32>
    %113 = vector.shape_cast %112 : vector<16xf32> to vector<16x1xf32>
    %cst_37 = arith.constant 3.200000e+01 : f32
    %114 = vector.broadcast %cst_37 : f32 to vector<16x1xf32>
    %115 = arith.divf %113, %114 : vector<16x1xf32>
    %116 = arith.mulf %111, %111 : vector<16x32xf32>
    %cst_38 = arith.constant dense<0.000000e+00> : vector<16xf32>
    %117 = vector.multi_reduction <add>, %116, %cst_38 [1] : vector<16x32xf32> to vector<16xf32>
    %118 = vector.shape_cast %117 : vector<16xf32> to vector<16x1xf32>
    %cst_39 = arith.constant 3.200000e+01 : f32
    %119 = vector.broadcast %cst_39 : f32 to vector<16x1xf32>
    %120 = arith.divf %118, %119 : vector<16x1xf32>
    %121 = arith.mulf %115, %115 : vector<16x1xf32>
    %122 = arith.subf %120, %121 : vector<16x1xf32>
    %123 = vector.broadcast %115 : vector<16x1xf32> to vector<16x32xf32>
    %124 = arith.subf %111, %123 : vector<16x32xf32>
    %cst_40 = arith.constant 9.99999997E-7 : f32
    %125 = vector.broadcast %cst_40 : f32 to vector<16x1xf32>
    %126 = arith.addf %122, %125 : vector<16x1xf32>
    %127 = math.rsqrt %126 : vector<16x1xf32>
    %128 = vector.broadcast %127 : vector<16x1xf32> to vector<16x32xf32>
    %129 = arith.mulf %124, %128 : vector<16x32xf32>
    %130 = vector.broadcast %19 : vector<1x32xf32> to vector<16x32xf32>
    %131 = arith.mulf %129, %130 : vector<16x32xf32>
    %132 = vector.broadcast %20 : vector<1x32xf32> to vector<16x32xf32>
    %133 = arith.addf %131, %132 : vector<16x32xf32>
    %cst_41 = arith.constant dense<0.000000e+00> : vector<16x128xf32>
    %134 = tpu.matmul %133, %9, %cst_41 {dimension_numbers = #tpu.dot_dimension_numbers<[1], [0], [0], [1], [0, 0, 1, 1], [], []>} : vector<16x32xf32>, vector<32x128xf32>, vector<16x128xf32> -> vector<16x128xf32>
    %135 = vector.broadcast %21 : vector<1x128xf32> to vector<16x128xf32>
    %136 = arith.addf %134, %135 : vector<16x128xf32>
    %cst_42 = arith.constant 0.000000e+00 : f32
    %137 = vector.broadcast %cst_42 : f32 to vector<16x128xf32>
    %138 = arith.maximumf %136, %137 : vector<16x128xf32>
    %cst_43 = arith.constant dense<0.000000e+00> : vector<16x32xf32>
    %139 = tpu.matmul %138, %10, %cst_43 {dimension_numbers = #tpu.dot_dimension_numbers<[1], [0], [0], [1], [0, 0, 1, 1], [], []>} : vector<16x128xf32>, vector<128x32xf32>, vector<16x32xf32> -> vector<16x32xf32>
    %140 = vector.broadcast %22 : vector<1x32xf32> to vector<16x32xf32>
    %141 = arith.addf %139, %140 : vector<16x32xf32>
    %142 = arith.addf %111, %141 : vector<16x32xf32>
    %cst_44 = arith.constant dense<0.000000e+00> : vector<16xf32>
    %143 = vector.multi_reduction <add>, %142, %cst_44 [1] : vector<16x32xf32> to vector<16xf32>
    %144 = vector.shape_cast %143 : vector<16xf32> to vector<16x1xf32>
    %cst_45 = arith.constant 3.200000e+01 : f32
    %145 = vector.broadcast %cst_45 : f32 to vector<16x1xf32>
    %146 = arith.divf %144, %145 : vector<16x1xf32>
    %147 = arith.mulf %142, %142 : vector<16x32xf32>
    %cst_46 = arith.constant dense<0.000000e+00> : vector<16xf32>
    %148 = vector.multi_reduction <add>, %147, %cst_46 [1] : vector<16x32xf32> to vector<16xf32>
    %149 = vector.shape_cast %148 : vector<16xf32> to vector<16x1xf32>
    %cst_47 = arith.constant 3.200000e+01 : f32
    %150 = vector.broadcast %cst_47 : f32 to vector<16x1xf32>
    %151 = arith.divf %149, %150 : vector<16x1xf32>
    %152 = arith.mulf %146, %146 : vector<16x1xf32>
    %153 = arith.subf %151, %152 : vector<16x1xf32>
    %154 = vector.broadcast %146 : vector<16x1xf32> to vector<16x32xf32>
    %155 = arith.subf %142, %154 : vector<16x32xf32>
    %cst_48 = arith.constant 9.99999997E-7 : f32
    %156 = vector.broadcast %cst_48 : f32 to vector<16x1xf32>
    %157 = arith.addf %153, %156 : vector<16x1xf32>
    %158 = math.rsqrt %157 : vector<16x1xf32>
    %159 = vector.broadcast %158 : vector<16x1xf32> to vector<16x32xf32>
    %160 = arith.mulf %155, %159 : vector<16x32xf32>
    %161 = vector.broadcast %23 : vector<1x32xf32> to vector<16x32xf32>
    %162 = arith.mulf %160, %161 : vector<16x32xf32>
    %163 = vector.broadcast %24 : vector<1x32xf32> to vector<16x32xf32>
    %164 = arith.addf %162, %163 : vector<16x32xf32>
    %c0_49 = arith.constant 0 : index
    %c0_50 = arith.constant 0 : index
    %165 = vector.load %arg2[%c0_49, %c0_50] : memref<16x32xf32, #tpu.memory_space<vmem>>, vector<16x32xf32>
    tpu.vector_store %arg2[%c0_49, %c0_50], %164 {strides = array<i32>} : memref<16x32xf32, #tpu.memory_space<vmem>>, vector<16x32xf32>,
    return
  }
}

</mosaic_0001>

<bundles_post_ra>
// kernel: tile.15
= control target key start
LH: loop header
LB: loop body
LE: loop exit
PB: predicated region body
PF: predicated region fallthrough
CT: control target
= control target key end

     0   :  { %vm82_vm0 = vcmask 1047556   ;;  %vm84_vm1 = vcmask 130048   ;;  %s195_s9 = smov 48   ;;  %s196_s14 = smov 16   ;;  %vm103_vm2 = vcmask 523648   ;;  %vm124_vm3 = vcmask 392448   ;;  %s289_s0 = inlined_call_operand.vmem [shape: f32[16,4,16], index: 0, kind: input, shape index: {}]   ;;  %s290_s1 = inlined_call_operand.vmem [shape: f32[16,64], index: 1, kind: output, shape index: {}]  }
   0x1   :  { %v180_v0 = vld [vmem:[%s289_s0 + $0x1c] sm:$0xf]  ;;  %v181_v1 = vld [vmem:[%s289_s0 + $0x18] sm:$0xf]  ;;  %v182_v2 = vld [vmem:[%s289_s0 + $0x14] sm:$0xf] }
   0x2   :  { %48 = vst [vmem:[#allocation0 + $0x38] sm:$0xf] %v180_v0  ;;  %53 = vst [vmem:[#allocation0 + $0x30] sm:$0xf] %v181_v1  ;;  %v183_v3 = vld [vmem:[%s289_s0 + $0x10] sm:$0xf] }
   0x3   :  { %58 = vst [vmem:[#allocation0 + $0x28] sm:$0xf] %v182_v2  ;;  %v184_v4 = vld [vmem:[%s289_s0 + $0xc] sm:$0xf]  ;;  %v185_v5 = vld [vmem:[%s289_s0 + $0x8] sm:$0xf] }
   0x4   :  { %63 = vst [vmem:[#allocation0 + $0x20] sm:$0xf] %v183_v3  ;;  %68 = vst [vmem:[#allocation0 + $0x18] sm:$0xf] %v184_v4  ;;  %v186_v6 = vld [vmem:[%s289_s0 + $0x4] sm:$0xf] }
   0x5   :  { %73 = vst [vmem:[#allocation0 + $0x10] sm:$0xf] %v185_v5  ;;  %v78_v7 = vld [vmem:[%s289_s0] sm:$0xf]  ;;  %77 = vst [vmem:[#allocation0 + $0x8] sm:$0xf] %v186_v6 }
   0x6   :  { %79 = vst [vmem:[#allocation0] sm:$0xf] %v78_v7  ;;  %v172_v8 = vld [vmem:[%s289_s0 + $0x3c] sm:$0xf]  ;;  %v173_v9 = vld [vmem:[%s289_s0 + $0x38] sm:$0xf] }
   0x7   :  { %8 = vst [vmem:[#allocation0 + $0x78] sm:$0xf] %v172_v8  ;;  %13 = vst [vmem:[#allocation0 + $0x70] sm:$0xf] %v173_v9  ;;  %v174_v10 = vld [vmem:[%s289_s0 + $0x34] sm:$0xf] }
   0x8   :  { %v175_v11 = vld [vmem:[%s289_s0 + $0x30] sm:$0xf]  ;;  %v176_v12 = vld [vmem:[%s289_s0 + $0x2c] sm:$0xf]  ;;  %18 = vst [vmem:[#allocation0 + $0x68] sm:$0xf] %v174_v10 }
   0x9   :  { %23 = vst [vmem:[#allocation0 + $0x60] sm:$0xf] %v175_v11  ;;  %28 = vst [vmem:[#allocation0 + $0x58] sm:$0xf] %v176_v12  ;;  %v177_v13 = vld [vmem:[%s289_s0 + $0x28] sm:$0xf] }
   0xa   :  { %v178_v14 = vld [vmem:[%s289_s0 + $0x24] sm:$0xf]  ;;  %v179_v15 = vld [vmem:[%s289_s0 + $0x20] sm:$0xf]  ;;  %33 = vst [vmem:[#allocation0 + $0x50] sm:$0xf] %v177_v13 }
   0xb   :  { %38 = vst [vmem:[#allocation0 + $0x48] sm:$0xf] %v178_v14  ;;  %43 = vst [vmem:[#allocation0 + $0x40] sm:$0xf] %v179_v15  ;;  %s194_s0 = smov 32   ;;  %vm145_vm4 = vcmask 261248  }
   0xc   :  { %v119_v16 = vld [vmem:[#allocation0 + $0x2] ss:$8 sm:$0xf0]   ;;  %v98_v17 = vld [vmem:[#allocation0 + $0x3] ss:$8 sm:$0xf0]  }
   0xd   :  { %v117_v18 = vld [vmem:[#allocation0 + $0x2] ss:$8 sm:$0xf]   ;;  %v96_v19 = vld [vmem:[#allocation0 + $0x3] ss:$8 sm:$0xf]  }
   0xe   :  { %v121_v20 = vsel %vm82_vm0, %v119_v16, %v117_v18  ;;  %v100_v21 = vsel %vm82_vm0, %v98_v17, %v96_v19  ;;  %v138_v24 = vld [vmem:[#allocation0 + $0x1] ss:$8 sm:$0xf]   ;;  %v80_v32 = vld [vmem:[#allocation0] ss:$8 sm:$0xf]  }
   0xf   :  { %122 = vrot.lane.b32.xlu1 %v121_v20, %s194_s0  ;;  %101 = vrot.lane.b32.xlu0 %v100_v21, %s195_s9  ;;  %v140_v25 = vld [vmem:[#allocation0 + $0x1] ss:$8 sm:$0xf0]   ;;  %v81_v33 = vld [vmem:[#allocation0] ss:$8 sm:$0xf0]  }
  0x10   :  { %v129_v22 = vld [vmem:[#allocation0 + $0x42] ss:$8 sm:$0xf0]   ;;  %v108_v23 = vld [vmem:[#allocation0 + $0x43] ss:$8 sm:$0xf0]   ;;  %v83_v34 = vsel %vm82_vm0, %v81_v33, %v80_v32  ;;  %v142_v38 = vsel %vm82_vm0, %v140_v25, %v138_v24 }
  0x11   :  { %v150_v31 = vld [vmem:[#allocation0 + $0x41] ss:$8 sm:$0xf0]   ;;  %v89_v36 = vld [vmem:[#allocation0 + $0x40] ss:$8 sm:$0xf0]  }
  0x12   :  { %v127_v26 = vld [vmem:[#allocation0 + $0x42] ss:$8 sm:$0xf]   ;;  %v106_v27 = vld [vmem:[#allocation0 + $0x43] ss:$8 sm:$0xf]  }
  0x13   :  { %v131_v28 = vsel %vm82_vm0, %v129_v22, %v127_v26  ;;  %v110_v29 = vsel %vm82_vm0, %v108_v23, %v106_v27  ;;  %v148_v30 = vld [vmem:[#allocation0 + $0x41] ss:$8 sm:$0xf]   ;;  %v87_v35 = vld [vmem:[#allocation0 + $0x40] ss:$8 sm:$0xf]  }
  0x14   :  { %132 = vrot.lane.b32.xlu1 %v131_v28, %s194_s0  ;;  %111 = vrot.lane.b32.xlu0 %v110_v29, %s195_s9  ;;  %v152_v37 = vsel %vm82_vm0, %v150_v31, %v148_v30  ;;  %85 = vst.msk [vmem:[%s290_s1] sm:$0xff] %vm84_vm1, %v83_v34   ;;  %v91_v39 = vsel %vm82_vm0, %v89_v36, %v87_v35 }
  0x15   :  { %187 = vst.msk [vmem:[%s290_s1 + $0x8] sm:$0xff] %vm84_vm1, %v91_v39  }
  0x18   :  { %153 = vrot.lane.b32.xlu1 %v152_v37, %s196_s14  ;;  %143 = vrot.lane.b32.xlu0 %v142_v38, %s196_s14 }
  0x81   :  { %v123_v40 = vpop.permute.xlu1 %122   ;;  %v102_v41 = vpop.permute.xlu0 %101  }
  0x82   :  { %104 = vst.msk [vmem:[%s290_s1] sm:$0xff] %vm103_vm2, %v102_v41  }
  0x83   :  { %125 = vst.msk [vmem:[%s290_s1] sm:$0xff] %vm124_vm3, %v123_v40  }
  0x86   :  { %v133_v42 = vpop.permute.xlu1 %132   ;;  %v112_v43 = vpop.permute.xlu0 %111  }
  0x87   :  { %188 = vst.msk [vmem:[%s290_s1 + $0x8] sm:$0xff] %vm103_vm2, %v112_v43  }
  0x88   :  { %189 = vst.msk [vmem:[%s290_s1 + $0x8] sm:$0xff] %vm124_vm3, %v133_v42  }
  0x8a   :  { %v154_v44 = vpop.permute.xlu1 %153   ;;  %v144_v45 = vpop.permute.xlu0 %143  }
  0x8b   :  { %190 = vst.msk [vmem:[%s290_s1 + $0x8] sm:$0xff] %vm145_vm4, %v154_v44   ;;  %146 = vst.msk [vmem:[%s290_s1] sm:$0xff] %vm145_vm4, %v144_v45  }

// kernel: refine_encoder_pallas.1
= control target key start
LH: loop header
LB: loop body
LE: loop exit
PB: predicated region body
PF: predicated region fallthrough
CT: control target
= control target key end

     0   :  { %s2595_s0 = inlined_call_operand.vmem [shape: f32[16,320], index: 0, kind: input, shape index: {}]   ;;  %s2596_s1 = inlined_call_operand.vmem [shape: f32[408,128], index: 1, kind: input, shape index: {}]   ;;  %s2597_s2 = inlined_call_operand.hbm [shape: f32[16,32], index: 2, kind: output, shape index: {}]  }
   0x1   :  { %v2233_v0 = vld [vmem:[%s2595_s0] sm:$0xff]  ;;  %v2238_v1 = vld [vmem:[%s2595_s0 + $0x18] sm:$0xff] }
   0x2   :  { %7 = vsyncpa [#allocation3], 0  ;;  %v2196_v2 = vmov 40   ;;  %vm69_vm0 = vcmp.gt.f32.partialorder %v2233_v0, 0.5  ;;  %vm70_vm1 = vcmp.gt.f32.partialorder %v2238_v1, 0.5  ;;  %v2197_v3 = vmov 0  }
   0x3   :  { %2111 = vset.pattern.permute.xlu0 %v2196_v2  ;;  %v71_v4 = vsel %vm69_vm0, 1, %v2197_v3  ;;  %v72_v5 = vsel %vm70_vm1, 1, %v2197_v3  ;;  %v18_v6 = vld [vmem:[%s2596_s1] sm:$0xf]  ;;  %vm98_vm2 = vcmask 1043456   ;;  %s2198_s15 = smov 96   ;;  %v83_v31 = vlaneseq }
   0x4   :  { %74 = vperm.xlu0 %2111, %v71_v4   ;;  %1781 = vmatprep.subr.msk.mxu0 %vm98_vm2, %v18_v6  ;;  %vm93_vm5 = vcmask 31744   ;;  %v19_v13 = vld [vmem:[%s2596_s1 + $0x8] sm:$0xff]  ;;  %v20_v14 = vld [vmem:[%s2596_s1 + $0x10] sm:$0xff]  ;;  %v21_v15 = vld [vmem:[%s2596_s1 + $0x18] sm:$0xff]  ;;  %s2199_s14 = smov 32   ;;  %vm185_vm6 = vcmask 261120  }
   0x5   :  { %1782 = vmatpush3.msk.msra.mxu0 %vm98_vm2, %v18_v6  ;;  %v1956_v16 = vpack.c.bf16 %v20_v14, %v19_v13  ;;  %v22_v17 = vld [vmem:[%s2596_s1 + $0x20] sm:$0xff]  ;;  %v23_v19 = vld [vmem:[%s2596_s1 + $0x28] sm:$0xff]  ;;  %v24_v20 = vld [vmem:[%s2596_s1 + $0x30] sm:$0xff]  ;;  %v2285_v32 = vshrl.u32 %v83_v31, 7  ;;  %vm192_vm7 = vcmask 785408   ;;  %vm408_vm8 = vcmask 64512  }
   0x6   :  { %v1960_v18 = vpack.c.bf16 %v22_v17, %v21_v15  ;;  %v1964_v21 = vpack.c.bf16 %v24_v20, %v23_v19  ;;  %v25_v22 = vld [vmem:[%s2596_s1 + $0x38] sm:$0xff]  ;;  %v26_v23 = vld [vmem:[%s2596_s1 + $0x40] sm:$0xff]  ;;  %v27_v25 = vld [vmem:[%s2596_s1 + $0x48] sm:$0xff]  ;;  %s2200_s24 = smov 88   ;;  %s2201_s25 = smov 120   ;;  %vm789_vm10 = vcmask 130048  }
   0x7   :  { %1957 = vmatprep.subr.bf16.mxu1 %v1956_v16  ;;  %v1968_v24 = vpack.c.bf16 %v26_v23, %v25_v22  ;;  %v28_v26 = vld [vmem:[%s2596_s1 + $0x50] sm:$0xff]  ;;  %v29_v28 = vld [vmem:[%s2596_s1 + $0x58] sm:$0xff]  ;;  %v30_v29 = vld [vmem:[%s2596_s1 + $0x60] sm:$0xff]  ;;  %v85_v33 = vsub.s32 0, %v2285_v32  ;;  %v190_v44 = vsub.s32 1, %v2285_v32  ;;  %v313_v13 = vsub.s32 3, %v2285_v32 }
   0x8   :  { %77 = vperm.xlu0 %2111, %v72_v5   ;;  %1959 = vmatpush3.bf16.msra.mxu1 %v1956_v16  ;;  %v1972_v27 = vpack.c.bf16 %v28_v26, %v27_v25  ;;  %v1976_v30 = vpack.c.bf16 %v30_v29, %v29_v28  ;;  %v2291_v34 = vld [vmem:[%s2596_s1 + $0x148] sm:$0xff]  ;;  %v32_v57 = vld [vmem:[%s2596_s1 + $0x70] sm:$0xff]  ;;  %v33_v59 = vld [vmem:[%s2596_s1 + $0x78] sm:$0xff]  ;;  %v319_v26 = vsub.s32 4, %v2285_v32  ;;  %s2202_s26 = smov 80   ;;  %s2203_s27 = smov 112  }
   0x9   :  { %1961 = vmatprep.subr.bf16.mxu1 %v1960_v18  ;;  %v86_v35 = vrot.slane %v2291_v34, %v85_v33  ;;  %v191_v45 = vrot.slane %v2291_v34, %v190_v44  ;;  %v31_v56 = vld [vmem:[%s2596_s1 + $0x68] sm:$0xff]  ;;  %v34_v60 = vld [vmem:[%s2596_s1 + $0x80] sm:$0xff]  ;;  %s2204_s28 = smov 72   ;;  %s2205_s29 = smov 104   ;;  %vm2359_vm9 = vmpackc.low %vm408_vm8, %vm408_vm8  ;;  %vm794_vm11 = vcmask 392192   ;;  %vm801_vm12 = vcmask 523264  }
   0xa   :  { %v1980_v58 = vpack.c.bf16 %v32_v57, %v31_v56  ;;  %v1984_v61 = vpack.c.bf16 %v34_v60, %v33_v59  ;;  %s2206_s30 = smov 16   ;;  %s2207_s3 = smov 48   ;;  %vm1289_vm13 = vcmask 195584  }
   0xb   :  { %s2208_s21 = smov 56   ;;  %s2210_s6 = smov 40  }
   0xc   :  { %1963 = vmatpush3.bf16.msra.mxu1 %v1960_v18  ;;  %1981 = vmatprep.subr.bf16.mxu0 %v1980_v58  ;;  %v314_v18 = vrot.slane %v2291_v34, %v313_v13  ;;  %s2211_s11 = smov 8   ;;  %s2212_s12 = smov 24  }
   0xd   :  { %1965 = vmatprep.subr.bf16.mxu1 %v1964_v21 }
  0x10   :  { %1967 = vmatpush3.bf16.msra.mxu1 %v1964_v21 }
  0x11   :  { %1969 = vmatprep.subr.bf16.mxu1 %v1968_v24 }
  0x14   :  { %1971 = vmatpush3.bf16.msra.mxu1 %v1968_v24 }
  0x15   :  { %1973 = vmatprep.subr.bf16.mxu1 %v1972_v27 }
  0x18   :  { %1975 = vmatpush3.bf16.msra.mxu1 %v1972_v27  ;;  %v320_v27 = vrot.slane %v2291_v34, %v319_v26 }
  0x19   :  { %1977 = vmatprep.subr.bf16.mxu1 %v1976_v30 }
  0x1c   :  { %1979 = vmatpush3.bf16.msra.mxu1 %v1976_v30 }
  0x83   :  { %v75_v7 = vpop.permute.xlu0 %74 }
  0x84   :  { %vm79_vm3 = vcmp.eq.s32.totalorder %v75_v7, 1 }
  0x85   :  { %v81_v8 = vsel %vm79_vm3, %v2233_v0, 2.0 }
  0x86   :  { %89 = vrot.lane.b32.xlu1 %v81_v8, %s2198_s15 }
  0x87   :  { %v78_v9 = vpop.permute.xlu0 %77 }
  0x88   :  { %vm80_vm4 = vcmp.eq.s32.totalorder %v78_v9, 1 }
  0x89   :  { %v82_v10 = vsel %vm80_vm4, %v2238_v1, 2.0 }
  0x8a   :  { %91 = vrot.lane.b32.xlu1 %v82_v10, %s2198_s15 }
  0xf8   :  { %v90_v11 = vpop.permute.xlu1 %89 }
  0xf9   :  { %1783 = vmatprep.mubr.msk.f32.mxu0 %vm93_vm5, %v90_v11 }
  0xfc   :  { %v92_v12 = vpop.permute.xlu1 %91 }
  0xfd   :  { %1784 = vmatmul.mubr.msk.f32.vlgmr.msra.gmra.mrb[0].mxu0 %vm93_vm5, %v92_v12  ;;  %v307_v12 = vsub.s32 2, %v2285_v32 }
  0xfe   :  { %1983 = vmatpush3.bf16.msra.mxu0 %v1980_v58 }
  0xff   :  { %1985 = vmatprep.subr.bf16.mxu0 %v1984_v61  ;;  %v308_v15 = vrot.slane %v2291_v34, %v307_v12 }
 0x102   :  { %1987 = vmatpush3.bf16.msra.mxu0 %v1984_v61 }
 0x1d0   :  { %v1785_v36 = vpop.f32.mrb[0].mxu0 }
 0x1d1   :  { %v174_v37 = vadd.f32 %v1785_v36, %v86_v35  ;;  %v168_v38 = vpop.f32.mrb[1].mxu0 }
 0x1d2   :  { %v169_v39 = vadd.f32 %v168_v38, %v86_v35 }
 0x1d3   :  { %181 = vrot.lane.b32.xlu1 %v174_v37, %s2199_s14 }
 0x1d4   :  { %179 = vrot.lane.b32.xlu0 %v169_v39, %s2199_s14 }
 0x245   :  { %v182_v40 = vpop.permute.xlu1 %181 }
 0x246   :  { %v180_v41 = vpop.permute.xlu0 %179  ;;  %v187_v43 = vsel %vm185_vm6, %v2238_v1, %v182_v40 }
 0x247   :  { %v186_v42 = vsel %vm185_vm6, %v2233_v0, %v180_v41 }
 0x248   :  { %1810 = vmatprep.mubr.msk.f32.mxu1 %vm192_vm7, %v186_v42  ;;  %v66_v42 = vld [vmem:[%s2596_s1 + $0x190] sm:$0xff] }
 0x249   :  { %1811 = vmatmul.mubr.msk.f32.vlgmr.msra.gmra.mrb[0].mxu1 %vm192_vm7, %v187_v43 }
 0x31c   :  { %v1812_v46 = vpop.f32.mrb[0].mxu1 }
 0x31d   :  { %v2306_v47 = vadd.f32 %v1812_v46, %v191_v45  ;;  %v265_v48 = vpop.f32.mrb[1].mxu1 }
 0x31e   :  { %v2308_v49 = vadd.f32 %v265_v48, %v191_v45 }
 0x31f   :  { %v277_v50 = vsel %vm185_vm6, %v2306_v47, 0.0  ;;  %v284_v54 = vmul.f32 %v2306_v47, %v2306_v47 }
 0x320   :  { %278 = vadd.xlane.f32.xlu1 %v277_v50  ;;  %v274_v51 = vsel %vm185_vm6, %v2308_v49, 0.0  ;;  %v283_v52 = vmul.f32 %v2308_v49, %v2308_v49 }
 0x321   :  { %275 = vadd.xlane.f32.xlu0 %v274_v51  ;;  %v288_v55 = vsel %vm185_vm6, %v284_v54, 0.0 }
 0x322   :  { %v285_v53 = vsel %vm185_vm6, %v283_v52, 0.0 }
 0x325   :  { %286 = vadd.xlane.f32.xlu0 %v285_v53 }
 0x329   :  { %289 = vadd.xlane.f32.xlu0 %v288_v55 }
 0x3ad   :  { %v279_v0 = vpop.xlane.xlu1 %278 }
 0x3ae   :  { %v276_v62 = vpop.xlane.xlu0 %275  ;;  %v282_v2 = vmul.f32 0.03125, %v279_v0 }
 0x3af   :  { %v281_v63 = vmul.f32 0.03125, %v276_v62 }
 0x3b0   :  { %v294_v7 = vmul.f32 %v282_v2, %v282_v2  ;;  %v298_v19 = vsub.f32 %v2306_v47, %v282_v2 }
 0x3b1   :  { %v293_v3 = vmul.f32 %v281_v63, %v281_v63  ;;  %v297_v14 = vsub.f32 %v2308_v49, %v281_v63 }
 0x3b2   :  { %v287_v1 = vpop.xlane.xlu0 %286 }
 0x3b3   :  { %v291_v4 = vmul.f32 0.03125, %v287_v1 }
 0x3b5   :  { %v295_v5 = vsub.f32 %v291_v4, %v293_v3 }
 0x3b6   :  { %v290_v6 = vpop.xlane.xlu0 %289 }
 0x3b7   :  { %v299_v8 = vadd.f32 1e-06, %v295_v5  ;;  %v292_v9 = vmul.f32 0.03125, %v290_v6  ;;  %v59_v6 = vld [vmem:[%s2596_s1 + $0x158] sm:$0xff] }
 0x3b9   :  { %2152 = vrsqrt.f32 %v299_v8  ;;  %v296_v10 = vsub.f32 %v292_v9, %v294_v7  ;;  %v60_v7 = vld [vmem:[%s2596_s1 + $0x160] sm:$0xff]  ;;  %v61_v8 = vld [vmem:[%s2596_s1 + $0x168] sm:$0xff] }
 0x3ba   :  { %v2012_v9 = vpack.c.bf16 %v60_v7, %v59_v6 }
 0x3bb   :  { %v300_v11 = vadd.f32 1e-06, %v296_v10  ;;  %v62_v10 = vld [vmem:[%s2596_s1 + $0x170] sm:$0xff] }
 0x3bd   :  { %2154 = vrsqrt.f32 %v300_v11  ;;  %v2016_v11 = vpack.c.bf16 %v62_v10, %v61_v8  ;;  %v17_v10 = vld [vmem:[%s2595_s0 + $0x28] sm:$0xff] }
 0x3c3   :  { %v2153_v16 = vpop.eup %2152 }
 0x3c4   :  { %v303_v17 = vmul.f32 %v2153_v16, %v297_v14 }
 0x3c6   :  { %v309_v20 = vmul.f32 %v308_v15, %v303_v17 }
 0x3c7   :  { %v2155_v21 = vpop.eup %2154 }
 0x3c8   :  { %v304_v22 = vmul.f32 %v2155_v21, %v298_v19  ;;  %v315_v23 = vadd.f32 %v314_v18, %v309_v20 }
 0x3ca   :  { %v310_v24 = vmul.f32 %v308_v15, %v304_v22  ;;  %1821 = vmatprep.mubr.msk.f32.mxu0 %vm185_vm6, %v315_v23 }
 0x3cc   :  { %v316_v25 = vadd.f32 %v314_v18, %v310_v24 }
 0x3ce   :  { %1822 = vmatmul.mubr.msk.f32.vlgmr.msra.gmra.mrb[2].mxu0 %vm185_vm6, %v316_v25  ;;  %v15_v25 = vld [vmem:[%s2595_s0 + $0x20] sm:$0xff] }
 0x4a1   :  { %v1823_v28 = vpop.f32.mrb[2].mxu0 }
 0x4a2   :  { %v399_v29 = vadd.f32 %v1823_v28, %v320_v27  ;;  %v393_v30 = vpop.f32.mrb[3].mxu0  ;;  %v14_v28 = vld [vmem:[%s2595_s0 + $0x8] sm:$0xff] }
 0x4a3   :  { %v394_v31 = vadd.f32 %v393_v30, %v320_v27 }
 0x4a5   :  { %1828 = vmatprep.mubr.msk.f32.mxu0 %vm408_vm8, %v394_v31  ;;  %v2347_v35 = vpack.i.bf16 %v399_v29, %v394_v31 }
 0x4a7   :  { %2118 = vrot.lane.b32.xlu0 %v2347_v35, %s2200_s24  ;;  %2113 = vrot.lane.b32.xlu1 %v2347_v35, %s2198_s15 }
 0x4ab   :  { %492 = vrot.lane.b32.xlu0 %v394_v31, %s2201_s25  ;;  %2123 = vrot.lane.b32.xlu1 %v2347_v35, %s2202_s26 }
 0x4af   :  { %583 = vrot.lane.b32.xlu0 %v394_v31, %s2203_s27  ;;  %2128 = vrot.lane.b32.xlu1 %v2347_v35, %s2204_s28  ;;  %s2209_s28 = smov 64  }
 0x4b3   :  { %674 = vrot.lane.b32.xlu0 %v394_v31, %s2205_s29  ;;  %494 = vrot.lane.b32.xlu1 %v399_v29, %s2201_s25 }
 0x4b7   :  { %585 = vrot.lane.b32.xlu1 %v399_v29, %s2203_s27 }
 0x4bb   :  { %676 = vrot.lane.b32.xlu1 %v399_v29, %s2205_s29 }
 0x519   :  { %v2119_v36 = vpop.permute.xlu0 %2118  ;;  %v2114_v37 = vpop.permute.xlu1 %2113 }
 0x51a   :  { %v2121_v38 = vunpack.i.h.bf16 %v2119_v36  ;;  %v2120_v39 = vunpack.i.l.bf16 %v2119_v36  ;;  %v2116_v40 = vunpack.i.h.bf16 %v2114_v37  ;;  %v2115_v41 = vunpack.i.l.bf16 %v2114_v37 }
 0x51c   :  { %v1988_v43 = vpack.c.bf16 %v2116_v40, %v2115_v41  ;;  %v1994_v48 = vpack.c.bf16 %v2121_v38, %v2120_v39  ;;  %v63_v38 = vld [vmem:[%s2596_s1 + $0x178] sm:$0xff]  ;;  %v64_v39 = vld [vmem:[%s2596_s1 + $0x180] sm:$0xff]  ;;  %v65_v41 = vld [vmem:[%s2596_s1 + $0x188] sm:$0xff] }
 0x51d   :  { %v493_v45 = vpop.permute.xlu0 %492  ;;  %v2124_v46 = vpop.permute.xlu1 %2123  ;;  %v2020_v40 = vpack.c.bf16 %v64_v39, %v63_v38  ;;  %v37_v39 = vld [vmem:[%s2596_s1 + $0x98] sm:$0xff] }
 0x51e   :  { %v2126_v50 = vunpack.i.h.bf16 %v2124_v46  ;;  %v2125_v51 = vunpack.i.l.bf16 %v2124_v46  ;;  %1990 = vmatprep.subr.msk.bf16.mxu0 %vm2359_vm9, %v1988_v43 }
 0x51f   :  { %1993 = vmatpush3.bf16.xpose.msk.msra.mxu0 %vm2359_vm9, %v1988_v43  ;;  %v2024_v43 = vpack.c.bf16 %v66_v42, %v65_v41 }
 0x520   :  { %v2000_v52 = vpack.c.bf16 %v2126_v50, %v2125_v51  ;;  %1996 = vmatprep.subr.msk.bf16.mxu0 %vm2359_vm9, %v1994_v48 }
 0x521   :  { %v584_v53 = vpop.permute.xlu0 %583  ;;  %v2129_v54 = vpop.permute.xlu1 %2128 }
 0x522   :  { %v2131_v55 = vunpack.i.h.bf16 %v2129_v54  ;;  %v2130_v56 = vunpack.i.l.bf16 %v2129_v54  ;;  %2002 = vmatprep.subr.msk.bf16.mxu1 %vm2359_vm9, %v2000_v52  ;;  %1842 = vmatprep.mubr.msk.f32.mxu1 %vm408_vm8, %v584_v53 }
 0x523   :  { %2005 = vmatpush3.bf16.xpose.msk.msra.mxu1 %vm2359_vm9, %v2000_v52 }
 0x524   :  { %v2006_v58 = vpack.c.bf16 %v2131_v55, %v2130_v56 }
 0x525   :  { %v495_v57 = vpop.permute.xlu1 %494  ;;  %v675_v60 = vpop.permute.xlu0 %674 }
 0x526   :  { %1829 = vmatmul.mubr.msk.f32.vlgmr.msra.gmra.mrb[4].mxu0 %vm408_vm8, %v399_v29 }
 0x527   :  { %1999 = vmatpush3.bf16.xpose.msk.msra.mxu0 %vm2359_vm9, %v1994_v48  ;;  %1835 = vmatprep.mubr.msk.f32.mxu0 %vm408_vm8, %v493_v45 }
 0x528   :  { %2008 = vmatprep.subr.msk.bf16.mxu0 %vm2359_vm9, %v2006_v58 }
 0x529   :  { %v586_v59 = vpop.permute.xlu1 %585 }
 0x52a   :  { %1843 = vmatmul.mubr.msk.f32.vlgmr.msra.gmra.mrb[2].mxu1 %vm408_vm8, %v586_v59 }
 0x52d   :  { %v677_v61 = vpop.permute.xlu1 %676 }
 0x52e   :  { %1836 = vmatmul.mubr.msk.f32.vlgmr.msra.gmra.mrb[6].mxu0 %vm408_vm8, %v495_v57 }
 0x52f   :  { %2011 = vmatpush3.bf16.xpose.msk.msra.mxu0 %vm2359_vm9, %v2006_v58  ;;  %1849 = vmatprep.mubr.msk.f32.mxu0 %vm408_vm8, %v675_v60 }
 0x530   :  { %2013 = vmatprep.subr.bf16.mxu0 %v2012_v9 }
 0x536   :  { %1850 = vmatmul.mubr.msk.f32.vlgmr.msra.gmra.mrb[8].mxu0 %vm408_vm8, %v677_v61 }
 0x537   :  { %2015 = vmatpush3.bf16.msra.mxu0 %v2012_v9 }
 0x538   :  { %2017 = vmatprep.subr.bf16.mxu0 %v2016_v11 }
 0x53b   :  { %2019 = vmatpush3.bf16.msra.mxu0 %v2016_v11 }
 0x53c   :  { %2021 = vmatprep.subr.bf16.mxu0 %v2020_v40 }
 0x53f   :  { %2023 = vmatpush3.bf16.msra.mxu0 %v2020_v40  ;;  %v38_v40 = vld [vmem:[%s2596_s1 + $0xa0] sm:$0xff] }
 0x540   :  { %2025 = vmatprep.subr.bf16.mxu0 %v2024_v43  ;;  %v2048_v41 = vpack.c.bf16 %v38_v40, %v37_v39  ;;  %v55_v40 = vld [vmem:[%s2596_s1 + $0x128] sm:$0xff] }
 0x543   :  { %2027 = vmatpush3.bf16.msra.mxu0 %v2024_v43 }
 0x5f9   :  { %v1830_v62 = vpop.f32.mrb[4].mxu0 }
 0x5fa   :  { %v483_v63 = vpop.f32.mrb[5].mxu0 }
 0x5fd   :  { %v1844_v0 = vpop.f32.mrb[2].mxu1 }
 0x5fe   :  { %777 = vrot.lane.b32.xlu1 %v1844_v0, %s2199_s14  ;;  %v665_v1 = vpop.f32.mrb[3].mxu1 }
 0x5ff   :  { %775 = vrot.lane.b32.xlu0 %v665_v1, %s2199_s14 }
 0x601   :  { %v1837_v2 = vpop.f32.mrb[6].mxu0 }
 0x602   :  { %769 = vrot.lane.b32.xlu1 %v1837_v2, %s2206_s30  ;;  %v574_v3 = vpop.f32.mrb[7].mxu0 }
 0x603   :  { %767 = vrot.lane.b32.xlu0 %v574_v3, %s2206_s30 }
 0x609   :  { %v1851_v4 = vpop.f32.mrb[8].mxu0 }
 0x60a   :  { %785 = vrot.lane.b32.xlu1 %v1851_v4, %s2207_s3  ;;  %v756_v5 = vpop.f32.mrb[9].mxu0 }
 0x60b   :  { %783 = vrot.lane.b32.xlu0 %v756_v5, %s2207_s3 }
 0x670   :  { %v778_v14 = vpop.permute.xlu1 %777 }
 0x671   :  { %v776_v15 = vpop.permute.xlu0 %775 }
 0x674   :  { %v770_v16 = vpop.permute.xlu1 %769 }
 0x675   :  { %v768_v17 = vpop.permute.xlu0 %767  ;;  %v791_v18 = vsel %vm789_vm10, %v1830_v62, %v770_v16 }
 0x676   :  { %v790_v19 = vsel %vm789_vm10, %v483_v63, %v768_v17  ;;  %v793_v20 = vsel %vm185_vm6, %v791_v18, %v778_v14  ;;  %v16_v14 = vld [vmem:[%s2595_s0 + $0x10] sm:$0xff] }
 0x677   :  { %v792_v23 = vsel %vm185_vm6, %v790_v19, %v776_v15 }
 0x67c   :  { %v786_v21 = vpop.permute.xlu1 %785 }
 0x67d   :  { %v796_v22 = vsel %vm794_vm11, %v793_v20, %v786_v21  ;;  %v784_v24 = vpop.permute.xlu0 %783 }
 0x67e   :  { %v798_v26 = vmul.f32 0.35355338, %v796_v22  ;;  %v795_v27 = vsel %vm794_vm11, %v792_v23, %v784_v24 }
 0x67f   :  { %v797_v29 = vmul.f32 0.35355338, %v795_v27 }
 0x680   :  { %v800_v30 = vadd.f32 %v798_v26, %v15_v25 }
 0x681   :  { %v799_v31 = vadd.f32 %v797_v29, %v14_v28 }
 0x682   :  { %v805_v36 = vsel %vm801_vm12, %v800_v30, -inf }
 0x683   :  { %806 = vmax.xlane.f32.xlu1 %v805_v36  ;;  %v802_v37 = vsel %vm801_vm12, %v799_v31, -inf  ;;  %v35_v36 = vld [vmem:[%s2596_s1 + $0x88] sm:$0xff] }
 0x684   :  { %803 = vmax.xlane.f32.xlu0 %v802_v37  ;;  %v36_v37 = vld [vmem:[%s2596_s1 + $0x90] sm:$0xff] }
 0x685   :  { %v2044_v38 = vpack.c.bf16 %v36_v37, %v35_v36  ;;  %v53_v37 = vld [vmem:[%s2596_s1 + $0x118] sm:$0xff] }
 0x687   :  { %2045 = vmatprep.subr.bf16.mxu1 %v2044_v38 }
 0x688   :  { %2047 = vmatpush3.bf16.msra.mxu1 %v2044_v38  ;;  %v54_v38 = vld [vmem:[%s2596_s1 + $0x120] sm:$0xff] }
 0x689   :  { %2049 = vmatprep.subr.bf16.mxu1 %v2048_v41  ;;  %v2080_v39 = vpack.c.bf16 %v54_v38, %v53_v37 }
 0x68c   :  { %2051 = vmatpush3.bf16.msra.mxu1 %v2048_v41  ;;  %v56_v41 = vld [vmem:[%s2596_s1 + $0x130] sm:$0xff] }
 0x694   :  { %2138 = vrot.lane.b32.xlu1 %v2347_v35, %s2208_s21 }
 0x69a   :  { %2133 = vrot.lane.b32.xlu0 %v2347_v35, %s2209_s28 }
 0x69e   :  { %2143 = vrot.lane.b32.xlu0 %v2347_v35, %s2207_s3 }
 0x710   :  { %v807_v45 = vpop.xlane.xlu1 %806 }
 0x711   :  { %v809_v46 = vsub.f32 %v800_v30, %v807_v45  ;;  %v804_v48 = vpop.xlane.xlu0 %803 }
 0x712   :  { %v808_v50 = vsub.f32 %v799_v31, %v804_v48 }
 0x713   :  { %v812_v51 = vmul.f32 1.442695, %v809_v46 }
 0x714   :  { %v810_v52 = vmul.f32 1.442695, %v808_v50  ;;  %v2139_v57 = vpop.permute.xlu1 %2138 }
 0x715   :  { %v2134_v53 = vpop.permute.xlu0 %2133  ;;  %v2141_v58 = vunpack.i.h.bf16 %v2139_v57  ;;  %v2140_v59 = vunpack.i.l.bf16 %v2139_v57 }
 0x716   :  { %2156 = vpow2.f32 %v810_v52  ;;  %v2136_v54 = vunpack.i.h.bf16 %v2134_v53  ;;  %v2135_v55 = vunpack.i.l.bf16 %v2134_v53 }
 0x717   :  { %2158 = vpow2.f32 %v812_v51  ;;  %v2032_v62 = vpack.c.bf16 %v2141_v58, %v2140_v59 }
 0x718   :  { %v2028_v56 = vpack.c.bf16 %v2136_v54, %v2135_v55 }
 0x719   :  { %v2144_v8 = vpop.permute.xlu0 %2143 }
 0x71a   :  { %2029 = vmatprep.subr.bf16.mxu0 %v2028_v56  ;;  %v2146_v16 = vunpack.i.h.bf16 %v2144_v8  ;;  %v2145_v17 = vunpack.i.l.bf16 %v2144_v8 }
 0x71c   :  { %v2036_v20 = vpack.c.bf16 %v2146_v16, %v2145_v17  ;;  %v41_v16 = vld [vmem:[%s2596_s1 + $0xb8] sm:$0xff]  ;;  %v42_v17 = vld [vmem:[%s2596_s1 + $0xc0] sm:$0xff] }
 0x720   :  { %v2157_v60 = vpop.eup %2156 }
 0x721   :  { %v2159_v61 = vpop.eup %2158  ;;  %1868 = vmatprep.mubr.msk.f32.mxu0 %vm801_vm12, %v2157_v60 }
 0x722   :  { %1869 = vmatmul.mubr.msk.f32.vlgmr.msra.gmra.mrb[10].mxu0 %vm801_vm12, %v2159_v61 }
 0x723   :  { %2031 = vmatpush3.bf16.msra.mxu0 %v2028_v56 }
 0x724   :  { %2033 = vmatprep.subr.bf16.mxu0 %v2032_v62 }
 0x7f5   :  { %v1870_v63 = vpop.f32.mrb[10].mxu0 }
 0x7f6   :  { %2160 = vrcp.f32 %v1870_v63  ;;  %v886_v0 = vpop.f32.mrb[11].mxu0 }
 0x7f7   :  { %2162 = vrcp.f32 %v886_v0 }
 0x800   :  { %v2161_v1 = vpop.eup %2160 }
 0x801   :  { %v2163_v2 = vpop.eup %2162  ;;  %v898_v3 = vmul.f32 %v2161_v1, %v1870_v63  ;;  %v1294_v63 = vsub.s32 5, %v2285_v32 }
 0x802   :  { %v897_v4 = vmul.f32 %v2163_v2, %v886_v0 }
 0x803   :  { %v900_v5 = vsub.f32 2.0, %v898_v3  ;;  %v1295_v0 = vrot.slane %v2291_v34, %v1294_v63 }
 0x804   :  { %v899_v6 = vsub.f32 2.0, %v897_v4 }
 0x805   :  { %v902_v7 = vmul.f32 %v2161_v1, %v900_v5 }
 0x806   :  { %v901_v9 = vmul.f32 %v2163_v2, %v899_v6 }
 0x807   :  { %v904_v11 = vmul.f32 %v2159_v61, %v902_v7 }
 0x808   :  { %v903_v15 = vmul.f32 %v2157_v60, %v901_v9 }
 0x809   :  { %v906_v18 = vmul.f32 %v904_v11, %v17_v10  ;;  %v39_v11 = vld [vmem:[%s2596_s1 + $0xa8] sm:$0xff] }
 0x80a   :  { %v905_v19 = vmul.f32 %v903_v15, %v16_v14  ;;  %v40_v14 = vld [vmem:[%s2596_s1 + $0xb0] sm:$0xff] }
 0x80b   :  { %996 = vrot.lane.b32.xlu0 %v906_v18, %s2203_s27  ;;  %v2052_v15 = vpack.c.bf16 %v40_v14, %v39_v11  ;;  %v68_v14 = vld [vmem:[%s2596_s1 + $0x150] sm:$0xf] }
 0x80c   :  { %994 = vrot.lane.b32.xlu1 %v905_v19, %s2203_s27  ;;  %1875 = vmatprep.mubr.msk.f32.mxu0 %vm789_vm10, %v905_v19 }
 0x80d   :  { %1876 = vmatmul.mubr.msk.f32.vlgmr.msra.gmra.mrb[12].mxu0 %vm789_vm10, %v906_v18 }
 0x80e   :  { %2035 = vmatpush3.bf16.msra.mxu0 %v2032_v62 }
 0x80f   :  { %2037 = vmatprep.subr.bf16.mxu0 %v2036_v20  ;;  %1083 = vrot.lane.b32.xlu0 %v905_v19, %s2198_s15 }
 0x810   :  { %2148 = vrot.lane.b32.xlu1 %v2347_v35, %s2210_s6 }
 0x813   :  { %1172 = vrot.lane.b32.xlu0 %v905_v19, %s2202_s26  ;;  %v43_v19 = vld [vmem:[%s2596_s1 + $0xc8] sm:$0xff] }
 0x814   :  { %1085 = vrot.lane.b32.xlu1 %v906_v18, %s2198_s15 }
 0x818   :  { %1174 = vrot.lane.b32.xlu1 %v906_v18, %s2202_s26  ;;  %v2056_v18 = vpack.c.bf16 %v42_v17, %v41_v16 }
 0x87d   :  { %v997_v21 = vpop.permute.xlu0 %996 }
 0x87e   :  { %v995_v22 = vpop.permute.xlu1 %994 }
 0x87f   :  { %1882 = vmatprep.mubr.msk.f32.mxu0 %vm789_vm10, %v995_v22 }
 0x880   :  { %1883 = vmatmul.mubr.msk.f32.vlgmr.msra.gmra.mrb[14].mxu0 %vm789_vm10, %v997_v21  ;;  %v45_v21 = vld [vmem:[%s2596_s1 + $0xd8] sm:$0xff] }
 0x881   :  { %2039 = vmatpush3.bf16.msra.mxu0 %v2036_v20  ;;  %v1084_v23 = vpop.permute.xlu0 %1083  ;;  %v44_v20 = vld [vmem:[%s2596_s1 + $0xd0] sm:$0xff] }
 0x882   :  { %v2149_v24 = vpop.permute.xlu1 %2148  ;;  %1889 = vmatprep.mubr.msk.f32.mxu0 %vm789_vm10, %v1084_v23  ;;  %v2060_v22 = vpack.c.bf16 %v44_v20, %v43_v19  ;;  %v46_v23 = vld [vmem:[%s2596_s1 + $0xe0] sm:$0xff] }
 0x883   :  { %v2151_v25 = vunpack.i.h.bf16 %v2149_v24  ;;  %v2150_v26 = vunpack.i.l.bf16 %v2149_v24  ;;  %v2064_v24 = vpack.c.bf16 %v46_v23, %v45_v21 }
 0x884   :  { %2061 = vmatprep.subr.bf16.mxu1 %v2060_v22 }
 0x885   :  { %v2040_v35 = vpack.c.bf16 %v2151_v25, %v2150_v26  ;;  %v1173_v28 = vpop.permute.xlu0 %1172  ;;  %v47_v25 = vld [vmem:[%s2596_s1 + $0xe8] sm:$0xff]  ;;  %v48_v26 = vld [vmem:[%s2596_s1 + $0xf0] sm:$0xff] }
 0x886   :  { %v1086_v27 = vpop.permute.xlu1 %1085 }
 0x887   :  { %1890 = vmatmul.mubr.msk.f32.vlgmr.msra.gmra.mrb[16].mxu0 %vm789_vm10, %v1086_v27  ;;  %2041 = vmatprep.subr.bf16.mxu0 %v2040_v35  ;;  %v49_v27 = vld [vmem:[%s2596_s1 + $0xf8] sm:$0xff] }
 0x888   :  { %2043 = vmatpush3.bf16.msra.mxu0 %v2040_v35  ;;  %1896 = vmatprep.mubr.msk.f32.mxu0 %vm789_vm10, %v1173_v28  ;;  %v2068_v35 = vpack.c.bf16 %v48_v26, %v47_v25  ;;  %v50_v28 = vld [vmem:[%s2596_s1 + $0x100] sm:$0xff] }
 0x889   :  { %2053 = vmatprep.subr.bf16.mxu0 %v2052_v15 }
 0x88a   :  { %v1175_v29 = vpop.permute.xlu1 %1174 }
 0x88b   :  { %1897 = vmatmul.mubr.msk.f32.vlgmr.msra.gmra.mrb[18].mxu0 %vm789_vm10, %v1175_v29  ;;  %v2072_v29 = vpack.c.bf16 %v50_v28, %v49_v27 }
 0x88c   :  { %2055 = vmatpush3.bf16.msra.mxu0 %v2052_v15  ;;  %v1424_v15 = vrot.slane %v68_v14, %v85_v33 }
 0x88d   :  { %2057 = vmatprep.subr.bf16.mxu0 %v2056_v18 }
 0x890   :  { %2059 = vmatpush3.bf16.msra.mxu0 %v2056_v18 }
 0x8e0   :  { %v1877_v30 = vpop.f32.mrb[12].mxu0 }
 0x8e1   :  { %v985_v31 = vpop.f32.mrb[13].mxu0 }
 0x953   :  { %v1884_v42 = vpop.f32.mrb[14].mxu0 }
 0x954   :  { %1265 = vrot.lane.b32.xlu1 %v1884_v42, %s2211_s11  ;;  %v1074_v43 = vpop.f32.mrb[15].mxu0  ;;  %v2084_v42 = vpack.c.bf16 %v56_v41, %v55_v40 }
 0x955   :  { %1263 = vrot.lane.b32.xlu0 %v1074_v43, %s2211_s11 }
 0x95a   :  { %v1891_v45 = vpop.f32.mrb[16].mxu0 }
 0x95b   :  { %1273 = vrot.lane.b32.xlu1 %v1891_v45, %s2206_s30  ;;  %v1163_v46 = vpop.f32.mrb[17].mxu0 }
 0x95c   :  { %1271 = vrot.lane.b32.xlu0 %v1163_v46, %s2206_s30 }
 0x95e   :  { %v1898_v48 = vpop.f32.mrb[18].mxu0 }
 0x95f   :  { %1281 = vrot.lane.b32.xlu1 %v1898_v48, %s2212_s12  ;;  %v1252_v50 = vpop.f32.mrb[19].mxu0 }
 0x960   :  { %1279 = vrot.lane.b32.xlu0 %v1252_v50, %s2212_s12 }
 0x9c6   :  { %v1266_v51 = vpop.permute.xlu1 %1265 }
 0x9c7   :  { %v1264_v52 = vpop.permute.xlu0 %1263  ;;  %v1286_v57 = vsel %vm408_vm8, %v1877_v30, %v1266_v51  ;;  %v51_v30 = vld [vmem:[%s2596_s1 + $0x108] sm:$0xff] }
 0x9c8   :  { %v1285_v55 = vsel %vm408_vm8, %v985_v31, %v1264_v52  ;;  %v52_v31 = vld [vmem:[%s2596_s1 + $0x110] sm:$0xff] }
 0x9c9   :  { %v2076_v36 = vpack.c.bf16 %v52_v31, %v51_v30 }
 0x9cd   :  { %v1274_v53 = vpop.permute.xlu1 %1273 }
 0x9ce   :  { %v1272_v54 = vpop.permute.xlu0 %1271  ;;  %v1288_v60 = vsel %vm789_vm10, %v1286_v57, %v1274_v53 }
 0x9cf   :  { %v1287_v58 = vsel %vm789_vm10, %v1285_v55, %v1272_v54 }
 0x9d1   :  { %v1282_v56 = vpop.permute.xlu1 %1281 }
 0x9d2   :  { %v1280_v59 = vpop.permute.xlu0 %1279  ;;  %v1291_v62 = vsel %vm1289_vm13, %v1288_v60, %v1282_v56  ;;  %v1411_v60 = vsub.s32 6, %v2285_v32 }
 0x9d3   :  { %v1290_v61 = vsel %vm1289_vm13, %v1287_v58, %v1280_v59 }
 0x9d4   :  { %1907 = vmatprep.mubr.msk.f32.mxu1 %vm185_vm6, %v1290_v61  ;;  %v1417_v61 = vsub.s32 7, %v2285_v32  ;;  %v1412_v63 = vrot.slane %v2291_v34, %v1411_v60 }
 0x9d5   :  { %1908 = vmatmul.mubr.msk.f32.vlgmr.msra.gmra.mrb[4].mxu1 %vm185_vm6, %v1291_v62 }
 0x9d6   :  { %2063 = vmatpush3.bf16.msra.mxu1 %v2060_v22  ;;  %v1511_v22 = vrot.slane %v68_v14, %v190_v44 }
 0x9d7   :  { %2065 = vmatprep.subr.bf16.mxu1 %v2064_v24 }
 0x9da   :  { %2067 = vmatpush3.bf16.msra.mxu1 %v2064_v24 }
 0x9db   :  { %2069 = vmatprep.subr.bf16.mxu1 %v2068_v35 }
 0x9de   :  { %2071 = vmatpush3.bf16.msra.mxu1 %v2068_v35 }
 0x9df   :  { %2073 = vmatprep.subr.bf16.mxu1 %v2072_v29 }
 0x9e2   :  { %2075 = vmatpush3.bf16.msra.mxu1 %v2072_v29 }
 0x9e3   :  { %2077 = vmatprep.subr.bf16.mxu1 %v2076_v36 }
 0x9e6   :  { %2079 = vmatpush3.bf16.msra.mxu1 %v2076_v36 }
 0x9e7   :  { %2081 = vmatprep.subr.bf16.mxu1 %v2080_v39 }
 0x9ea   :  { %2083 = vmatpush3.bf16.msra.mxu1 %v2080_v39 }
 0x9eb   :  { %2085 = vmatprep.subr.bf16.mxu1 %v2084_v42 }
 0x9ee   :  { %2087 = vmatpush3.bf16.msra.mxu1 %v2084_v42 }
 0xaa8   :  { %v1909_v1 = vpop.f32.mrb[4].mxu1 }
 0xaa9   :  { %v1374_v2 = vadd.f32 %v1909_v1, %v1295_v0  ;;  %v1368_v3 = vpop.f32.mrb[5].mxu1 }
 0xaaa   :  { %v1369_v4 = vadd.f32 %v1368_v3, %v1295_v0 }
 0xaab   :  { %v2480_v5 = vadd.f32 %v1374_v2, %v2306_v47  ;;  %v1418_v2 = vrot.slane %v2291_v34, %v1417_v61  ;;  %v58_v34 = vld [vmem:[%s2596_s1 + $0x140] sm:$0xff] }
 0xaac   :  { %v2483_v6 = vadd.f32 %v1369_v4, %v2308_v49 }
 0xaad   :  { %v1382_v7 = vsel %vm185_vm6, %v2480_v5, 0.0  ;;  %v1388_v47 = vmul.f32 %v2480_v5, %v2480_v5 }
 0xaae   :  { %1383 = vadd.xlane.f32.xlu1 %v1382_v7  ;;  %v1379_v8 = vsel %vm185_vm6, %v2483_v6, 0.0  ;;  %v1387_v9 = vmul.f32 %v2483_v6, %v2483_v6 }
 0xaaf   :  { %1380 = vadd.xlane.f32.xlu0 %v1379_v8  ;;  %v1392_v49 = vsel %vm185_vm6, %v1388_v47, 0.0 }
 0xab0   :  { %v1389_v10 = vsel %vm185_vm6, %v1387_v9, 0.0 }
 0xab3   :  { %1390 = vadd.xlane.f32.xlu0 %v1389_v10 }
 0xab7   :  { %1393 = vadd.xlane.f32.xlu0 %v1392_v49  ;;  %v57_v49 = vld [vmem:[%s2596_s1 + $0x138] sm:$0xff]  ;;  %s2213_s1 = smov [#allocation2]  }
 0xab8   :  { %v2088_v11 = vpack.c.bf16 %v58_v34, %v57_v49  ;;  %s1638_s29 = sshll.u32 %s2213_s1, 4  ;;  %s1639_s29 = int_to_ptr.vmem [resolvable:$true] %s1638_s29 }
 0xab9   :  { %s2172_s3 = scalar_lea.vmem %s1639_s29, 256  ;;  %p2177_p1 = scmp.lt.s32.totalorder %s1639_s29, %s1639_s29 }
 0xaba   :  { %2089 = vmatprep.subr.bf16.mxu1 %v2088_v11  ;;  %p2173_p0 = scmp.ne.s32.totalorder %s1639_s29, %s2172_s3  ;;  %p2178_p2 = scmp.lt.s32.totalorder %s2172_s3, %s2172_s3 }
 0xabb   :  { %2091 = vmatpush3.bf16.msra.mxu1 %v2088_v11 }
 0xabc   :  { %p2179_p3 = por %p2178_p2, %p2177_p1 }
 0xabe   :  { %p2180_p4 = pnand %p2179_p3, %p2173_p0 }
 0xb3b   :  { %v1384_v46 = vpop.xlane.xlu1 %1383 }
 0xb3c   :  { %v1381_v43 = vpop.xlane.xlu0 %1380  ;;  %v1386_v50 = vmul.f32 0.03125, %v1384_v46 }
 0xb3d   :  { %v1385_v45 = vmul.f32 0.03125, %v1381_v43 }
 0xb3e   :  { %v1398_v55 = vmul.f32 %v1386_v50, %v1386_v50  ;;  %v1402_v3 = vsub.f32 %v2480_v5, %v1386_v50 }
 0xb3f   :  { %v1397_v51 = vmul.f32 %v1385_v45, %v1385_v45  ;;  %v1401_v62 = vsub.f32 %v2483_v6, %v1385_v45 }
 0xb40   :  { %v1391_v48 = vpop.xlane.xlu0 %1390 }
 0xb41   :  { %v1395_v52 = vmul.f32 0.03125, %v1391_v48 }
 0xb43   :  { %v1399_v53 = vsub.f32 %v1395_v52, %v1397_v51  ;;  %v1622_v51 = vrot.slane %v68_v14, %v307_v12 }
 0xb44   :  { %v1394_v54 = vpop.xlane.xlu0 %1393 }
 0xb45   :  { %v1403_v56 = vadd.f32 1e-06, %v1399_v53  ;;  %v1396_v57 = vmul.f32 0.03125, %v1394_v54 }
 0xb47   :  { %2164 = vrsqrt.f32 %v1403_v56  ;;  %v1400_v58 = vsub.f32 %v1396_v57, %v1398_v55  ;;  %v1628_v56 = vrot.slane %v68_v14, %v313_v13 }
 0xb49   :  { %v1404_v59 = vadd.f32 1e-06, %v1400_v58 }
 0xb4b   :  { %2166 = vrsqrt.f32 %v1404_v59 }
 0xb51   :  { %v2165_v0 = vpop.eup %2164 }
 0xb52   :  { %v1407_v1 = vmul.f32 %v2165_v0, %v1401_v62 }
 0xb54   :  { %v1413_v4 = vmul.f32 %v1412_v63, %v1407_v1 }
 0xb55   :  { %v2167_v7 = vpop.eup %2166 }
 0xb56   :  { %v1408_v8 = vmul.f32 %v2167_v7, %v1402_v3  ;;  %v1419_v9 = vadd.f32 %v1418_v2, %v1413_v4 }
 0xb58   :  { %v1414_v10 = vmul.f32 %v1412_v63, %v1408_v8  ;;  %1918 = vmatprep.mubr.msk.f32.mxu0 %vm185_vm6, %v1419_v9 }
 0xb5a   :  { %v1420_v47 = vadd.f32 %v1418_v2, %v1414_v10 }
 0xb5c   :  { %1919 = vmatmul.mubr.msk.f32.vlgmr.msra.gmra.mrb[20].mxu0 %vm185_vm6, %v1420_v47 }
 0xc2f   :  { %v1920_v16 = vpop.f32.mrb[20].mxu0 }
 0xc30   :  { %v1503_v17 = vadd.f32 %v1920_v16, %v1424_v15  ;;  %v1497_v18 = vpop.f32.mrb[21].mxu0 }
 0xc31   :  { %v1498_v19 = vadd.f32 %v1497_v18, %v1424_v15 }
 0xc32   :  { %v1507_v21 = vmax.f32 %v1503_v17, 0.0 }
 0xc33   :  { %v1506_v20 = vmax.f32 %v1498_v19, 0.0 }
 0xc35   :  { %1953 = vmatprep.mubr.f32.mxu1 %v1506_v20 }
 0xc36   :  { %1954 = vmatmul.mubr.f32.vlgmr.msra.gmra.mrb[6].mxu1 %v1507_v21 }
 0xd09   :  { %v1955_v23 = vpop.f32.mrb[6].mxu1 }
 0xd0a   :  { %v1584_v24 = vadd.f32 %v1955_v23, %v1511_v22  ;;  %v1578_v25 = vpop.f32.mrb[7].mxu1 }
 0xd0b   :  { %v1579_v26 = vadd.f32 %v1578_v25, %v1511_v22 }
 0xd0c   :  { %v1588_v35 = vadd.f32 %v1584_v24, %v2480_v5 }
 0xd0d   :  { %v1587_v27 = vadd.f32 %v1579_v26, %v2483_v6 }
 0xd0e   :  { %v1592_v33 = vsel %vm185_vm6, %v1588_v35, 0.0  ;;  %v1598_v28 = vmul.f32 %v1588_v35, %v1588_v35 }
 0xd0f   :  { %1593 = vadd.xlane.f32.xlu0 %v1592_v33  ;;  %v1589_v29 = vsel %vm185_vm6, %v1587_v27, 0.0  ;;  %v1597_v30 = vmul.f32 %v1587_v27, %v1587_v27 }
 0xd10   :  { %1590 = vadd.xlane.f32.xlu1 %v1589_v29  ;;  %v1602_v31 = vsel %vm185_vm6, %v1598_v28, 0.0 }
 0xd11   :  { %v1599_v44 = vsel %vm185_vm6, %v1597_v30, 0.0 }
 0xd13   :  { %1603 = vadd.xlane.f32.xlu0 %v1602_v31 }
 0xd14   :  { %1600 = vadd.xlane.f32.xlu1 %v1599_v44 }
 0xd9c   :  { %v1594_v36 = vpop.xlane.xlu0 %1593 }
 0xd9d   :  { %v1596_v37 = vmul.f32 0.03125, %v1594_v36  ;;  %v1591_v38 = vpop.xlane.xlu1 %1590 }
 0xd9e   :  { %v1595_v5 = vmul.f32 0.03125, %v1591_v38 }
 0xd9f   :  { %v1608_v6 = vmul.f32 %v1596_v37, %v1596_v37  ;;  %v1612_v52 = vsub.f32 %v1588_v35, %v1596_v37 }
 0xda0   :  { %v1604_v39 = vpop.xlane.xlu0 %1603  ;;  %v1607_v42 = vmul.f32 %v1595_v5, %v1595_v5  ;;  %v1611_v54 = vsub.f32 %v1587_v27, %v1595_v5 }
 0xda1   :  { %v1606_v40 = vmul.f32 0.03125, %v1604_v39  ;;  %v1601_v41 = vpop.xlane.xlu1 %1600 }
 0xda2   :  { %v1605_v43 = vmul.f32 0.03125, %v1601_v41 }
 0xda3   :  { %v1610_v45 = vsub.f32 %v1606_v40, %v1608_v6 }
 0xda4   :  { %v1609_v46 = vsub.f32 %v1605_v43, %v1607_v42 }
 0xda5   :  { %v1614_v48 = vadd.f32 1e-06, %v1610_v45 }
 0xda6   :  { %v1613_v50 = vadd.f32 1e-06, %v1609_v46 }
 0xda7   :  { %2168 = vrsqrt.f32 %v1614_v48 }
 0xda8   :  { %2170 = vrsqrt.f32 %v1613_v50 }
 0xdb1   :  { %v2169_v53 = vpop.eup %2168 }
 0xdb2   :  { %v2171_v55 = vpop.eup %2170  ;;  %v1618_v57 = vmul.f32 %v2169_v53, %v1612_v52 }
 0xdb3   :  { %v1617_v58 = vmul.f32 %v2171_v55, %v1611_v54 }
 0xdb4   :  { %v1624_v59 = vmul.f32 %v1622_v51, %v1618_v57 }
 0xdb5   :  { %v1623_v60 = vmul.f32 %v1622_v51, %v1617_v58 }
 0xdb6   :  { %v1630_v61 = vadd.f32 %v1628_v56, %v1624_v59 }
 0xdb7   :  { %v1629_v62 = vadd.f32 %v1628_v56, %v1623_v60 }
 0xdb8   :  { %1632 = vst.msk [vmem:[#allocation2 + $0x8] sm:$0xff] %vm185_vm6, %v1630_v61 }
 0xdb9   :  { %1631 = vst.msk [vmem:[#allocation2] sm:$0xff] %vm185_vm6, %v1629_v62 }
 0xdba   :  { %2183 = shalt.err (!%p2180_p4)
}
 0xdbb   :  { %s2184_s6 = scalar_lea.hbm %s2597_s2, 256 }
 0xdbc   :  { %p2185_p5 = scmp.ne.s32.totalorder %s2597_s2, %s2184_s6  ;;  %p2188_p6 = scmp.lt.u32.totalorder %s2184_s6, %s2597_s2 }
 0xdbe   :  { %p2190_p7 = pnand %p2188_p6, %p2185_p5 }
 0xdc0   :  { %2193 = shalt.err (!%p2190_p7)
}
 0xdc1   :  { %s2214_s7 = smov 128  }
 0xdc2   :  { %1644 = dma.vmem_to_hbm [thread:$0]  %s1639_s29, 256, %s2597_s2, [#allocation3], %s2214_s7, %s2214_s7, %s2211_s11  }
 0xdc3   :  { %2194 = dma.done.wait [#allocation3], 256  }
 0xdc4   :  { %2195 = vsyncadd [#allocation3], 4294967040 }
 0xdc5   :  { %1648 = vsyncpa [#allocation3], 1 }

</bundles_post_ra>
